<compile_context>
chip_gen: v7x
topology: tpu7x:2x2x1
jax: 0.10.0
libtpu: 0.0.40
codegen_flags: <defaults>
</compile_context>

<pallas_src>
import functools

import jax
import jax.numpy as jnp
from jax.experimental import pallas as pl
from jax.experimental.pallas import tpu as pltpu


# ----------------------------------------------------------------------------
# Fused kernel: one grid step per batch element.
# ----------------------------------------------------------------------------
def fused_kernel(x_ref, mmat_ref, kall_ref, ball_ref, whh_ref,
                 fcw_ref, fcb_ref, o_ref, *, seq_len):
    x = x_ref[0]                                   # (T, N*C)

    # LayerNorm over each node's C-chunk (chunk mean/var via block-diag 1/C).
    m = mmat_ref[...]                              # (N*C, N*C)
    mu = jnp.dot(x, m, preferred_element_type=jnp.float32)
    xc = x - mu
    var = jnp.dot(xc * xc, m, preferred_element_type=jnp.float32)
    z = xc * jax.lax.rsqrt(var + 1e-5)             # normalized, (T, N*C)

    # LN-affine + GCN1 + GCN2 + LSTM input projection folded to ONE matmul.
    gates_x = (jnp.dot(z, kall_ref[...], preferred_element_type=jnp.float32)
               + ball_ref[...])                    # (T, 4*Dh)

    # LSTM recurrence (fully unrolled, tiny (1, Dh) lane-dense state).
    dh = whh_ref.shape[0]
    whh = whh_ref[...]
    hh = jnp.zeros((1, dh), jnp.float32)
    cc = jnp.zeros((1, dh), jnp.float32)
    for t in range(seq_len):
        gates = gates_x[t:t + 1, :] + jnp.dot(
            hh, whh, preferred_element_type=jnp.float32)   # (1, 4*Dh)
        i_g = jax.nn.sigmoid(gates[:, 0 * dh:1 * dh])
        f_g = jax.nn.sigmoid(gates[:, 1 * dh:2 * dh])
        g_g = jnp.tanh(gates[:, 2 * dh:3 * dh])
        o_g = jax.nn.sigmoid(gates[:, 3 * dh:4 * dh])
        cc = f_g * cc + i_g * g_g
        hh = o_g * jnp.tanh(cc)

    # Per-node fc as one matmul against kron(I_N, fc_w): (1, Dh) @ (Dh, N*O).
    out = jnp.dot(hh, fcw_ref[...],
                  preferred_element_type=jnp.float32) + fcb_ref[...]
    o_ref[0] = out                                 # (1, N*O)


# ----------------------------------------------------------------------------
# Glue: GCN normalized adjacency (PyG gcn_norm with self loops)
# ----------------------------------------------------------------------------
def build_gcn_adj(edge_index, num_nodes):
    src = edge_index[0]
    dst = edge_index[1]
    a = jnp.zeros((num_nodes, num_nodes), jnp.float32)
    a = a.at[dst, src].add(1.0)                         # A[target, source]
    a = a + jnp.eye(num_nodes, dtype=jnp.float32)       # self loops
    deg = jnp.sum(a, axis=1)
    dinv = jnp.where(deg > 0, 1.0 / jnp.sqrt(deg), 0.0)
    return dinv[:, None] * a * dinv[None, :]            # D^-1/2 (A+I) D^-1/2


# ----------------------------------------------------------------------------
# Full forward (single fused pallas_call; weight folding done in the wrapper)
# ----------------------------------------------------------------------------
def room_temperature_gnn_forward(params, x, edge_index):
    B, T, N, C = x.shape
    H = params["gcn1_w"].shape[1]
    Dh = params["lstm_whh_t"].shape[0]
    O = params["fc_w_t"].shape[1]
    hp = jax.lax.Precision.HIGHEST

    a_norm = build_gcn_adj(edge_index, N)                          # (N, N)
    eye_n = jnp.eye(N, dtype=jnp.float32)

    # Kron-expanded operators so the node dim lives in the lane dim in-kernel.
    mmat = jnp.kron(eye_n, jnp.full((C, C), 1.0 / C, jnp.float32))  # (NC, NC)
    k1 = jnp.kron(a_norm.T, params["gcn1_w"])                       # (NC, NH)
    k2 = jnp.kron(a_norm.T, params["gcn2_w"])                       # (NH, NH)
    wih = params["lstm_wih_t"]                                      # (NH, 4Dh)

    # Fold LN-affine -> GCN1 -> GCN2 -> LSTM input projection (all affine,
    # no nonlinearity between them) into a single matrix + bias.
    k2w = jnp.dot(k2, wih, precision=hp)                            # (NH, 4Dh)
    k12w = jnp.dot(k1, k2w, precision=hp)                           # (NC, 4Dh)
    gamma_flat = jnp.tile(params["ln_gamma"], (1, N))               # (1, NC)
    beta_flat = jnp.tile(params["ln_beta"], (1, N))                 # (1, NC)
    b1_flat = jnp.tile(params["gcn1_b"], (1, N))                    # (1, NH)
    b2_flat = jnp.tile(params["gcn2_b"], (1, N))                    # (1, NH)
    kall = gamma_flat.reshape(-1, 1) * k12w                         # (NC, 4Dh)
    ball = (jnp.dot(beta_flat, k12w, precision=hp)
            + jnp.dot(b1_flat, k2w, precision=hp)
            + jnp.dot(b2_flat, wih, precision=hp)
            + params["lstm_b"])                                     # (1, 4Dh)

    fcw_big = jnp.kron(eye_n, params["fc_w_t"])                     # (Dh, N*O)
    fcb_t = jnp.tile(params["fc_b"], (1, N))                        # (1, N*O)

    x_in = x.reshape(B, T, N * C).astype(jnp.float32)

    kernel = functools.partial(fused_kernel, seq_len=T)

    out = pl.pallas_call(
        kernel,
        out_shape=jax.ShapeDtypeStruct((B, 1, N * O), jnp.float32),
        grid=(B,),
        in_specs=[
            pl.BlockSpec((1, T, N * C), lambda b: (b, 0, 0)),   # x (per batch)
            pl.BlockSpec((N * C, N * C), lambda b: (0, 0)),     # chunk-mean mat
            pl.BlockSpec((N * C, 4 * Dh), lambda b: (0, 0)),    # folded Kall
            pl.BlockSpec((1, 4 * Dh), lambda b: (0, 0)),        # folded bias
            pl.BlockSpec((Dh, 4 * Dh), lambda b: (0, 0)),       # W_hh^T
            pl.BlockSpec((Dh, N * O), lambda b: (0, 0)),        # kron(I, fc_w)
            pl.BlockSpec((1, N * O), lambda b: (0, 0)),         # fc_b (tiled)
        ],
        out_specs=pl.BlockSpec((1, 1, N * O), lambda b: (b, 0, 0)),
        compiler_params=pltpu.CompilerParams(
            dimension_semantics=("parallel",)),
    )(x_in, mmat, kall, ball, params["lstm_whh_t"], fcw_big, fcb_t)

    return out.reshape(B, N, O)


# ----------------------------------------------------------------------------
# Pure-JAX reference (direct, per-node / per-step form) for validation
# ----------------------------------------------------------------------------
def reference_forward(params, x, edge_index):
    hp = jax.lax.Precision.HIGHEST
    B, T, N, C = x.shape
    a = build_gcn_adj(edge_index, N)
    xm = x.astype(jnp.float32)
    mu = jnp.mean(xm, axis=-1, keepdims=True)
    var = jnp.mean((xm - mu) ** 2, axis=-1, keepdims=True)
    xn = (xm - mu) / jnp.sqrt(var + 1e-5)
    xn = xn * params["ln_gamma"][0] + params["ln_beta"][0]
    h = jnp.einsum("btnc,ch->btnh", xn, params["gcn1_w"], precision=hp)
    h = jnp.einsum("nm,btmh->btnh", a, h, precision=hp) + params["gcn1_b"][0]
    h = jnp.einsum("btnh,hk->btnk", h, params["gcn2_w"], precision=hp)
    h = jnp.einsum("nm,btmh->btnh", a, h, precision=hp) + params["gcn2_b"][0]
    seq = h.reshape(B, T, -1)
    Dh = params["lstm_whh_t"].shape[0]
    hh = jnp.zeros((B, Dh), jnp.float32)
    cc = jnp.zeros((B, Dh), jnp.float32)
    for t in range(T):
        gates = (jnp.matmul(seq[:, t, :], params["lstm_wih_t"], precision=hp)
                 + jnp.matmul(hh, params["lstm_whh_t"], precision=hp)
                 + params["lstm_b"][0])
        i_g = jax.nn.sigmoid(gates[:, 0 * Dh:1 * Dh])
        f_g = jax.nn.sigmoid(gates[:, 1 * Dh:2 * Dh])
        g_g = jnp.tanh(gates[:, 2 * Dh:3 * Dh])
        o_g = jax.nn.sigmoid(gates[:, 3 * Dh:4 * Dh])
        cc = f_g * cc + i_g * g_g
        hh = o_g * jnp.tanh(cc)
    hn = hh.reshape(B, N, Dh // N)
    return jnp.einsum("bnp,po->bno", hn, params["fc_w_t"],
                      precision=hp) + params["fc_b"][0]


def init_params(key, in_channels, out_channels, num_nodes,
                gcn_hidden_dim, lstm_hidden_dim_per_node):
    ks = jax.random.split(key, 8)
    H = gcn_hidden_dim
    Din = H * num_nodes
    Dh = lstm_hidden_dim_per_node * num_nodes
    s = 0.1
    return {
        "ln_gamma": jnp.ones((1, in_channels), jnp.float32),
        "ln_beta": jnp.zeros((1, in_channels), jnp.float32),
        "gcn1_w": s * jax.random.normal(ks[0], (in_channels, H), jnp.float32),
        "gcn1_b": jnp.zeros((1, H), jnp.float32),
        "gcn2_w": s * jax.random.normal(ks[1], (H, H), jnp.float32),
        "gcn2_b": jnp.zeros((1, H), jnp.float32),
        # LSTM weights stored transposed: (Din, 4Dh) / (Dh, 4Dh);
        # gate order i, f, g, o (PyTorch convention). b = b_ih + b_hh.
        "lstm_wih_t": s * jax.random.normal(ks[2], (Din, 4 * Dh), jnp.float32),
        "lstm_whh_t": s * jax.random.normal(ks[3], (Dh, 4 * Dh), jnp.float32),
        "lstm_b": s * jax.random.normal(ks[4], (1, 4 * Dh), jnp.float32),
        "fc_w_t": s * jax.random.normal(
            ks[5], (lstm_hidden_dim_per_node, out_channels), jnp.float32),
        "fc_b": s * jax.random.normal(ks[6], (1, out_channels), jnp.float32),
    }


if __name__ == "__main__":
    # Small shapes consistent with the module.
    batch, time, num_nodes = 2, 8, 4
    in_channels, out_channels = 8, 3
    gcn_hidden_dim = 32
    lstm_hidden_dim_per_node = 32     # -> LSTM hidden = 128 (lane-dense)

    key = jax.random.PRNGKey(0)
    kx, kp = jax.random.split(key)
    x = jax.random.normal(kx, (batch, time, num_nodes, in_channels),
                          jnp.float32)
    # Bidirectional ring graph over 4 nodes: rows are (source, target).
    edge_index = jnp.array(
        [[0, 1, 1, 2, 2, 3, 3, 0],
         [1, 0, 2, 1, 3, 2, 0, 3]], dtype=jnp.int32)

    params = init_params(kp, in_channels, out_channels, num_nodes,
                         gcn_hidden_dim, lstm_hidden_dim_per_node)

    fwd = jax.jit(functools.partial(room_temperature_gnn_forward, params))
    out = fwd(x, edge_index)
    jax.block_until_ready(out)
    assert out.shape == (batch, num_nodes, out_channels), out.shape

    ref = reference_forward(params, x, edge_index)
    err = float(jnp.max(jnp.abs(out - ref)))
    assert err < 1e-2, f"max abs error vs reference: {err}"

    print("KERNEL_OK")
</pallas_src>

<mosaic_0001>
module attributes {stable_mosaic.version = 11 : i64} {
  func.func @fused_kernel(%arg0: i32, %arg1: memref<1x8x32xf32, #tpu.memory_space<vmem>>, %arg2: memref<32x32xf32, #tpu.memory_space<vmem>>, %arg3: memref<32x512xf32, #tpu.memory_space<vmem>>, %arg4: memref<1x512xf32, #tpu.memory_space<vmem>>, %arg5: memref<128x512xf32, #tpu.memory_space<vmem>>, %arg6: memref<128x12xf32, #tpu.memory_space<vmem>>, %arg7: memref<1x12xf32, #tpu.memory_space<vmem>>, %arg8: memref<1x1x12xf32, #tpu.memory_space<vmem>>) attributes {dimension_semantics = [#tpu.dimension_semantics<parallel>], iteration_bounds = array<i64: 2>, scalar_prefetch = 0 : i64, scratch_operands = 0 : i64, tpu.core_type = #tpu.core_type<tc>, window_params = [{transform_indices = @transform_0, window_bounds = array<i64: 1, 8, 32>}, {pipeline_mode = #tpu.pipeline_mode<synchronous>, transform_indices = @transform_1, window_bounds = array<i64: 32, 32>}, {pipeline_mode = #tpu.pipeline_mode<synchronous>, transform_indices = @transform_2, window_bounds = array<i64: 32, 512>}, {pipeline_mode = #tpu.pipeline_mode<synchronous>, transform_indices = @transform_3, window_bounds = array<i64: 1, 512>}, {pipeline_mode = #tpu.pipeline_mode<synchronous>, transform_indices = @transform_4, window_bounds = array<i64: 128, 512>}, {pipeline_mode = #tpu.pipeline_mode<synchronous>, transform_indices = @transform_5, window_bounds = array<i64: 128, 12>}, {pipeline_mode = #tpu.pipeline_mode<synchronous>, transform_indices = @transform_6, window_bounds = array<i64: 1, 12>}, {transform_indices = @transform_7, window_bounds = array<i64: 1, 1, 12>}]} {
    %c0 = arith.constant 0 : index
    %c0_0 = arith.constant 0 : index
    %c0_1 = arith.constant 0 : index
    %0 = vector.load %arg1[%c0, %c0_0, %c0_1] : memref<1x8x32xf32, #tpu.memory_space<vmem>>, vector<1x8x32xf32>
    %1 = vector.shape_cast %0 : vector<1x8x32xf32> to vector<8x32xf32>
    %c0_2 = arith.constant 0 : index
    %c0_3 = arith.constant 0 : index
    %2 = vector.load %arg2[%c0_2, %c0_3] : memref<32x32xf32, #tpu.memory_space<vmem>>, vector<32x32xf32>
    %cst = arith.constant dense<0.000000e+00> : vector<8x32xf32>
    %3 = tpu.matmul %1, %2, %cst {dimension_numbers = #tpu.dot_dimension_numbers<[1], [0], [0], [1], [0, 0, 1, 1], [], []>} : vector<8x32xf32>, vector<32x32xf32>, vector<8x32xf32> -> vector<8x32xf32>
    %4 = arith.subf %1, %3 : vector<8x32xf32>
    %5 = arith.mulf %4, %4 : vector<8x32xf32>
    %cst_4 = arith.constant dense<0.000000e+00> : vector<8x32xf32>
    %6 = tpu.matmul %5, %2, %cst_4 {dimension_numbers = #tpu.dot_dimension_numbers<[1], [0], [0], [1], [0, 0, 1, 1], [], []>} : vector<8x32xf32>, vector<32x32xf32>, vector<8x32xf32> -> vector<8x32xf32>
    %cst_5 = arith.constant 9.99999974E-6 : f32
    %7 = vector.broadcast %cst_5 : f32 to vector<8x32xf32>
    %8 = arith.addf %6, %7 : vector<8x32xf32>
    %9 = math.rsqrt %8 : vector<8x32xf32>
    %10 = arith.mulf %4, %9 : vector<8x32xf32>
    %c0_6 = arith.constant 0 : index
    %c0_7 = arith.constant 0 : index
    %11 = vector.load %arg3[%c0_6, %c0_7] : memref<32x512xf32, #tpu.memory_space<vmem>>, vector<32x512xf32>
    %cst_8 = arith.constant dense<0.000000e+00> : vector<8x512xf32>
    %12 = tpu.matmul %10, %11, %cst_8 {dimension_numbers = #tpu.dot_dimension_numbers<[1], [0], [0], [1], [0, 0, 1, 1], [], []>} : vector<8x32xf32>, vector<32x512xf32>, vector<8x512xf32> -> vector<8x512xf32>
    %c0_9 = arith.constant 0 : index
    %c0_10 = arith.constant 0 : index
    %13 = vector.load %arg4[%c0_9, %c0_10] : memref<1x512xf32, #tpu.memory_space<vmem>>, vector<1x512xf32>
    %14 = vector.broadcast %13 : vector<1x512xf32> to vector<8x512xf32>
    %15 = arith.addf %12, %14 : vector<8x512xf32>
    %c0_11 = arith.constant 0 : index
    %c0_12 = arith.constant 0 : index
    %16 = vector.load %arg5[%c0_11, %c0_12] : memref<128x512xf32, #tpu.memory_space<vmem>>, vector<128x512xf32>
    %cst_13 = arith.constant 0.000000e+00 : f32
    %17 = vector.broadcast %cst_13 : f32 to vector<1x128xf32>
    %cst_14 = arith.constant 0.000000e+00 : f32
    %18 = vector.broadcast %cst_14 : f32 to vector<1x128xf32>
    %19 = vector.extract_strided_slice %15 {offsets = [0, 0], sizes = [1, 512], strides = [1, 1]} : vector<8x512xf32> to vector<1x512xf32>
    %cst_15 = arith.constant dense<0.000000e+00> : vector<1x512xf32>
    %20 = tpu.matmul %17, %16, %cst_15 {dimension_numbers = #tpu.dot_dimension_numbers<[1], [0], [0], [1], [0, 0, 1, 1], [], []>} : vector<1x128xf32>, vector<128x512xf32>, vector<1x512xf32> -> vector<1x512xf32>
    %21 = arith.addf %19, %20 : vector<1x512xf32>
    %22 = vector.extract_strided_slice %21 {offsets = [0, 0], sizes = [1, 128], strides = [1, 1]} : vector<1x512xf32> to vector<1x128xf32>
    %23 = arith.negf %22 : vector<1x128xf32>
    %24 = math.exp %23 : vector<1x128xf32>
    %cst_16 = arith.constant 1.000000e+00 : f32
    %25 = vector.broadcast %cst_16 : f32 to vector<1x128xf32>
    %26 = arith.addf %25, %24 : vector<1x128xf32>
    %27 = arith.divf %25, %26 : vector<1x128xf32>
    %28 = vector.extract_strided_slice %21 {offsets = [0, 128], sizes = [1, 128], strides = [1, 1]} : vector<1x512xf32> to vector<1x128xf32>
    %29 = arith.negf %28 : vector<1x128xf32>
    %30 = math.exp %29 : vector<1x128xf32>
    %cst_17 = arith.constant 1.000000e+00 : f32
    %31 = vector.broadcast %cst_17 : f32 to vector<1x128xf32>
    %32 = arith.addf %31, %30 : vector<1x128xf32>
    %33 = arith.divf %31, %32 : vector<1x128xf32>
    %34 = vector.extract_strided_slice %21 {offsets = [0, 256], sizes = [1, 128], strides = [1, 1]} : vector<1x512xf32> to vector<1x128xf32>
    %35 = math.tanh %34 : vector<1x128xf32>
    %36 = vector.extract_strided_slice %21 {offsets = [0, 384], sizes = [1, 128], strides = [1, 1]} : vector<1x512xf32> to vector<1x128xf32>
    %37 = arith.negf %36 : vector<1x128xf32>
    %38 = math.exp %37 : vector<1x128xf32>
    %cst_18 = arith.constant 1.000000e+00 : f32
    %39 = vector.broadcast %cst_18 : f32 to vector<1x128xf32>
    %40 = arith.addf %39, %38 : vector<1x128xf32>
    %41 = arith.divf %39, %40 : vector<1x128xf32>
    %42 = arith.mulf %33, %18 : vector<1x128xf32>
    %43 = arith.mulf %27, %35 : vector<1x128xf32>
    %44 = arith.addf %42, %43 : vector<1x128xf32>
    %45 = math.tanh %44 : vector<1x128xf32>
    %46 = arith.mulf %41, %45 : vector<1x128xf32>
    %47 = vector.extract_strided_slice %15 {offsets = [1, 0], sizes = [1, 512], strides = [1, 1]} : vector<8x512xf32> to vector<1x512xf32>
    %cst_19 = arith.constant dense<0.000000e+00> : vector<1x512xf32>
    %48 = tpu.matmul %46, %16, %cst_19 {dimension_numbers = #tpu.dot_dimension_numbers<[1], [0], [0], [1], [0, 0, 1, 1], [], []>} : vector<1x128xf32>, vector<128x512xf32>, vector<1x512xf32> -> vector<1x512xf32>
    %49 = arith.addf %47, %48 : vector<1x512xf32>
    %50 = vector.extract_strided_slice %49 {offsets = [0, 0], sizes = [1, 128], strides = [1, 1]} : vector<1x512xf32> to vector<1x128xf32>
    %51 = arith.negf %50 : vector<1x128xf32>
    %52 = math.exp %51 : vector<1x128xf32>
    %cst_20 = arith.constant 1.000000e+00 : f32
    %53 = vector.broadcast %cst_20 : f32 to vector<1x128xf32>
    %54 = arith.addf %53, %52 : vector<1x128xf32>
    %55 = arith.divf %53, %54 : vector<1x128xf32>
    %56 = vector.extract_strided_slice %49 {offsets = [0, 128], sizes = [1, 128], strides = [1, 1]} : vector<1x512xf32> to vector<1x128xf32>
    %57 = arith.negf %56 : vector<1x128xf32>
    %58 = math.exp %57 : vector<1x128xf32>
    %cst_21 = arith.constant 1.000000e+00 : f32
    %59 = vector.broadcast %cst_21 : f32 to vector<1x128xf32>
    %60 = arith.addf %59, %58 : vector<1x128xf32>
    %61 = arith.divf %59, %60 : vector<1x128xf32>
    %62 = vector.extract_strided_slice %49 {offsets = [0, 256], sizes = [1, 128], strides = [1, 1]} : vector<1x512xf32> to vector<1x128xf32>
    %63 = math.tanh %62 : vector<1x128xf32>
    %64 = vector.extract_strided_slice %49 {offsets = [0, 384], sizes = [1, 128], strides = [1, 1]} : vector<1x512xf32> to vector<1x128xf32>
    %65 = arith.negf %64 : vector<1x128xf32>
    %66 = math.exp %65 : vector<1x128xf32>
    %cst_22 = arith.constant 1.000000e+00 : f32
    %67 = vector.broadcast %cst_22 : f32 to vector<1x128xf32>
    %68 = arith.addf %67, %66 : vector<1x128xf32>
    %69 = arith.divf %67, %68 : vector<1x128xf32>
    %70 = arith.mulf %61, %44 : vector<1x128xf32>
    %71 = arith.mulf %55, %63 : vector<1x128xf32>
    %72 = arith.addf %70, %71 : vector<1x128xf32>
    %73 = math.tanh %72 : vector<1x128xf32>
    %74 = arith.mulf %69, %73 : vector<1x128xf32>
    %75 = vector.extract_strided_slice %15 {offsets = [2, 0], sizes = [1, 512], strides = [1, 1]} : vector<8x512xf32> to vector<1x512xf32>
    %cst_23 = arith.constant dense<0.000000e+00> : vector<1x512xf32>
    %76 = tpu.matmul %74, %16, %cst_23 {dimension_numbers = #tpu.dot_dimension_numbers<[1], [0], [0], [1], [0, 0, 1, 1], [], []>} : vector<1x128xf32>, vector<128x512xf32>, vector<1x512xf32> -> vector<1x512xf32>
    %77 = arith.addf %75, %76 : vector<1x512xf32>
    %78 = vector.extract_strided_slice %77 {offsets = [0, 0], sizes = [1, 128], strides = [1, 1]} : vector<1x512xf32> to vector<1x128xf32>
    %79 = arith.negf %78 : vector<1x128xf32>
    %80 = math.exp %79 : vector<1x128xf32>
    %cst_24 = arith.constant 1.000000e+00 : f32
    %81 = vector.broadcast %cst_24 : f32 to vector<1x128xf32>
    %82 = arith.addf %81, %80 : vector<1x128xf32>
    %83 = arith.divf %81, %82 : vector<1x128xf32>
    %84 = vector.extract_strided_slice %77 {offsets = [0, 128], sizes = [1, 128], strides = [1, 1]} : vector<1x512xf32> to vector<1x128xf32>
    %85 = arith.negf %84 : vector<1x128xf32>
    %86 = math.exp %85 : vector<1x128xf32>
    %cst_25 = arith.constant 1.000000e+00 : f32
    %87 = vector.broadcast %cst_25 : f32 to vector<1x128xf32>
    %88 = arith.addf %87, %86 : vector<1x128xf32>
    %89 = arith.divf %87, %88 : vector<1x128xf32>
    %90 = vector.extract_strided_slice %77 {offsets = [0, 256], sizes = [1, 128], strides = [1, 1]} : vector<1x512xf32> to vector<1x128xf32>
    %91 = math.tanh %90 : vector<1x128xf32>
    %92 = vector.extract_strided_slice %77 {offsets = [0, 384], sizes = [1, 128], strides = [1, 1]} : vector<1x512xf32> to vector<1x128xf32>
    %93 = arith.negf %92 : vector<1x128xf32>
    %94 = math.exp %93 : vector<1x128xf32>
    %cst_26 = arith.constant 1.000000e+00 : f32
    %95 = vector.broadcast %cst_26 : f32 to vector<1x128xf32>
    %96 = arith.addf %95, %94 : vector<1x128xf32>
    %97 = arith.divf %95, %96 : vector<1x128xf32>
    %98 = arith.mulf %89, %72 : vector<1x128xf32>
    %99 = arith.mulf %83, %91 : vector<1x128xf32>
    %100 = arith.addf %98, %99 : vector<1x128xf32>
    %101 = math.tanh %100 : vector<1x128xf32>
    %102 = arith.mulf %97, %101 : vector<1x128xf32>
    %103 = vector.extract_strided_slice %15 {offsets = [3, 0], sizes = [1, 512], strides = [1, 1]} : vector<8x512xf32> to vector<1x512xf32>
    %cst_27 = arith.constant dense<0.000000e+00> : vector<1x512xf32>
    %104 = tpu.matmul %102, %16, %cst_27 {dimension_numbers = #tpu.dot_dimension_numbers<[1], [0], [0], [1], [0, 0, 1, 1], [], []>} : vector<1x128xf32>, vector<128x512xf32>, vector<1x512xf32> -> vector<1x512xf32>
    %105 = arith.addf %103, %104 : vector<1x512xf32>
    %106 = vector.extract_strided_slice %105 {offsets = [0, 0], sizes = [1, 128], strides = [1, 1]} : vector<1x512xf32> to vector<1x128xf32>
    %107 = arith.negf %106 : vector<1x128xf32>
    %108 = math.exp %107 : vector<1x128xf32>
    %cst_28 = arith.constant 1.000000e+00 : f32
    %109 = vector.broadcast %cst_28 : f32 to vector<1x128xf32>
    %110 = arith.addf %109, %108 : vector<1x128xf32>
    %111 = arith.divf %109, %110 : vector<1x128xf32>
    %112 = vector.extract_strided_slice %105 {offsets = [0, 128], sizes = [1, 128], strides = [1, 1]} : vector<1x512xf32> to vector<1x128xf32>
    %113 = arith.negf %112 : vector<1x128xf32>
    %114 = math.exp %113 : vector<1x128xf32>
    %cst_29 = arith.constant 1.000000e+00 : f32
    %115 = vector.broadcast %cst_29 : f32 to vector<1x128xf32>
    %116 = arith.addf %115, %114 : vector<1x128xf32>
    %117 = arith.divf %115, %116 : vector<1x128xf32>
    %118 = vector.extract_strided_slice %105 {offsets = [0, 256], sizes = [1, 128], strides = [1, 1]} : vector<1x512xf32> to vector<1x128xf32>
    %119 = math.tanh %118 : vector<1x128xf32>
    %120 = vector.extract_strided_slice %105 {offsets = [0, 384], sizes = [1, 128], strides = [1, 1]} : vector<1x512xf32> to vector<1x128xf32>
    %121 = arith.negf %120 : vector<1x128xf32>
    %122 = math.exp %121 : vector<1x128xf32>
    %cst_30 = arith.constant 1.000000e+00 : f32
    %123 = vector.broadcast %cst_30 : f32 to vector<1x128xf32>
    %124 = arith.addf %123, %122 : vector<1x128xf32>
    %125 = arith.divf %123, %124 : vector<1x128xf32>
    %126 = arith.mulf %117, %100 : vector<1x128xf32>
    %127 = arith.mulf %111, %119 : vector<1x128xf32>
    %128 = arith.addf %126, %127 : vector<1x128xf32>
    %129 = math.tanh %128 : vector<1x128xf32>
    %130 = arith.mulf %125, %129 : vector<1x128xf32>
    %131 = vector.extract_strided_slice %15 {offsets = [4, 0], sizes = [1, 512], strides = [1, 1]} : vector<8x512xf32> to vector<1x512xf32>
    %cst_31 = arith.constant dense<0.000000e+00> : vector<1x512xf32>
    %132 = tpu.matmul %130, %16, %cst_31 {dimension_numbers = #tpu.dot_dimension_numbers<[1], [0], [0], [1], [0, 0, 1, 1], [], []>} : vector<1x128xf32>, vector<128x512xf32>, vector<1x512xf32> -> vector<1x512xf32>
    %133 = arith.addf %131, %132 : vector<1x512xf32>
    %134 = vector.extract_strided_slice %133 {offsets = [0, 0], sizes = [1, 128], strides = [1, 1]} : vector<1x512xf32> to vector<1x128xf32>
    %135 = arith.negf %134 : vector<1x128xf32>
    %136 = math.exp %135 : vector<1x128xf32>
    %cst_32 = arith.constant 1.000000e+00 : f32
    %137 = vector.broadcast %cst_32 : f32 to vector<1x128xf32>
    %138 = arith.addf %137, %136 : vector<1x128xf32>
    %139 = arith.divf %137, %138 : vector<1x128xf32>
    %140 = vector.extract_strided_slice %133 {offsets = [0, 128], sizes = [1, 128], strides = [1, 1]} : vector<1x512xf32> to vector<1x128xf32>
    %141 = arith.negf %140 : vector<1x128xf32>
    %142 = math.exp %141 : vector<1x128xf32>
    %cst_33 = arith.constant 1.000000e+00 : f32
    %143 = vector.broadcast %cst_33 : f32 to vector<1x128xf32>
    %144 = arith.addf %143, %142 : vector<1x128xf32>
    %145 = arith.divf %143, %144 : vector<1x128xf32>
    %146 = vector.extract_strided_slice %133 {offsets = [0, 256], sizes = [1, 128], strides = [1, 1]} : vector<1x512xf32> to vector<1x128xf32>
    %147 = math.tanh %146 : vector<1x128xf32>
    %148 = vector.extract_strided_slice %133 {offsets = [0, 384], sizes = [1, 128], strides = [1, 1]} : vector<1x512xf32> to vector<1x128xf32>
    %149 = arith.negf %148 : vector<1x128xf32>
    %150 = math.exp %149 : vector<1x128xf32>
    %cst_34 = arith.constant 1.000000e+00 : f32
    %151 = vector.broadcast %cst_34 : f32 to vector<1x128xf32>
    %152 = arith.addf %151, %150 : vector<1x128xf32>
    %153 = arith.divf %151, %152 : vector<1x128xf32>
    %154 = arith.mulf %145, %128 : vector<1x128xf32>
    %155 = arith.mulf %139, %147 : vector<1x128xf32>
    %156 = arith.addf %154, %155 : vector<1x128xf32>
    %157 = math.tanh %156 : vector<1x128xf32>
    %158 = arith.mulf %153, %157 : vector<1x128xf32>
    %159 = vector.extract_strided_slice %15 {offsets = [5, 0], sizes = [1, 512], strides = [1, 1]} : vector<8x512xf32> to vector<1x512xf32>
    %cst_35 = arith.constant dense<0.000000e+00> : vector<1x512xf32>
    %160 = tpu.matmul %158, %16, %cst_35 {dimension_numbers = #tpu.dot_dimension_numbers<[1], [0], [0], [1], [0, 0, 1, 1], [], []>} : vector<1x128xf32>, vector<128x512xf32>, vector<1x512xf32> -> vector<1x512xf32>
    %161 = arith.addf %159, %160 : vector<1x512xf32>
    %162 = vector.extract_strided_slice %161 {offsets = [0, 0], sizes = [1, 128], strides = [1, 1]} : vector<1x512xf32> to vector<1x128xf32>
    %163 = arith.negf %162 : vector<1x128xf32>
    %164 = math.exp %163 : vector<1x128xf32>
    %cst_36 = arith.constant 1.000000e+00 : f32
    %165 = vector.broadcast %cst_36 : f32 to vector<1x128xf32>
    %166 = arith.addf %165, %164 : vector<1x128xf32>
    %167 = arith.divf %165, %166 : vector<1x128xf32>
    %168 = vector.extract_strided_slice %161 {offsets = [0, 128], sizes = [1, 128], strides = [1, 1]} : vector<1x512xf32> to vector<1x128xf32>
    %169 = arith.negf %168 : vector<1x128xf32>
    %170 = math.exp %169 : vector<1x128xf32>
    %cst_37 = arith.constant 1.000000e+00 : f32
    %171 = vector.broadcast %cst_37 : f32 to vector<1x128xf32>
    %172 = arith.addf %171, %170 : vector<1x128xf32>
    %173 = arith.divf %171, %172 : vector<1x128xf32>
    %174 = vector.extract_strided_slice %161 {offsets = [0, 256], sizes = [1, 128], strides = [1, 1]} : vector<1x512xf32> to vector<1x128xf32>
    %175 = math.tanh %174 : vector<1x128xf32>
    %176 = vector.extract_strided_slice %161 {offsets = [0, 384], sizes = [1, 128], strides = [1, 1]} : vector<1x512xf32> to vector<1x128xf32>
    %177 = arith.negf %176 : vector<1x128xf32>
    %178 = math.exp %177 : vector<1x128xf32>
    %cst_38 = arith.constant 1.000000e+00 : f32
    %179 = vector.broadcast %cst_38 : f32 to vector<1x128xf32>
    %180 = arith.addf %179, %178 : vector<1x128xf32>
    %181 = arith.divf %179, %180 : vector<1x128xf32>
    %182 = arith.mulf %173, %156 : vector<1x128xf32>
    %183 = arith.mulf %167, %175 : vector<1x128xf32>
    %184 = arith.addf %182, %183 : vector<1x128xf32>
    %185 = math.tanh %184 : vector<1x128xf32>
    %186 = arith.mulf %181, %185 : vector<1x128xf32>
    %187 = vector.extract_strided_slice %15 {offsets = [6, 0], sizes = [1, 512], strides = [1, 1]} : vector<8x512xf32> to vector<1x512xf32>
    %cst_39 = arith.constant dense<0.000000e+00> : vector<1x512xf32>
    %188 = tpu.matmul %186, %16, %cst_39 {dimension_numbers = #tpu.dot_dimension_numbers<[1], [0], [0], [1], [0, 0, 1, 1], [], []>} : vector<1x128xf32>, vector<128x512xf32>, vector<1x512xf32> -> vector<1x512xf32>
    %189 = arith.addf %187, %188 : vector<1x512xf32>
    %190 = vector.extract_strided_slice %189 {offsets = [0, 0], sizes = [1, 128], strides = [1, 1]} : vector<1x512xf32> to vector<1x128xf32>
    %191 = arith.negf %190 : vector<1x128xf32>
    %192 = math.exp %191 : vector<1x128xf32>
    %cst_40 = arith.constant 1.000000e+00 : f32
    %193 = vector.broadcast %cst_40 : f32 to vector<1x128xf32>
    %194 = arith.addf %193, %192 : vector<1x128xf32>
    %195 = arith.divf %193, %194 : vector<1x128xf32>
    %196 = vector.extract_strided_slice %189 {offsets = [0, 128], sizes = [1, 128], strides = [1, 1]} : vector<1x512xf32> to vector<1x128xf32>
    %197 = arith.negf %196 : vector<1x128xf32>
    %198 = math.exp %197 : vector<1x128xf32>
    %cst_41 = arith.constant 1.000000e+00 : f32
    %199 = vector.broadcast %cst_41 : f32 to vector<1x128xf32>
    %200 = arith.addf %199, %198 : vector<1x128xf32>
    %201 = arith.divf %199, %200 : vector<1x128xf32>
    %202 = vector.extract_strided_slice %189 {offsets = [0, 256], sizes = [1, 128], strides = [1, 1]} : vector<1x512xf32> to vector<1x128xf32>
    %203 = math.tanh %202 : vector<1x128xf32>
    %204 = vector.extract_strided_slice %189 {offsets = [0, 384], sizes = [1, 128], strides = [1, 1]} : vector<1x512xf32> to vector<1x128xf32>
    %205 = arith.negf %204 : vector<1x128xf32>
    %206 = math.exp %205 : vector<1x128xf32>
    %cst_42 = arith.constant 1.000000e+00 : f32
    %207 = vector.broadcast %cst_42 : f32 to vector<1x128xf32>
    %208 = arith.addf %207, %206 : vector<1x128xf32>
    %209 = arith.divf %207, %208 : vector<1x128xf32>
    %210 = arith.mulf %201, %184 : vector<1x128xf32>
    %211 = arith.mulf %195, %203 : vector<1x128xf32>
    %212 = arith.addf %210, %211 : vector<1x128xf32>
    %213 = math.tanh %212 : vector<1x128xf32>
    %214 = arith.mulf %209, %213 : vector<1x128xf32>
    %215 = vector.extract_strided_slice %15 {offsets = [7, 0], sizes = [1, 512], strides = [1, 1]} : vector<8x512xf32> to vector<1x512xf32>
    %cst_43 = arith.constant dense<0.000000e+00> : vector<1x512xf32>
    %216 = tpu.matmul %214, %16, %cst_43 {dimension_numbers = #tpu.dot_dimension_numbers<[1], [0], [0], [1], [0, 0, 1, 1], [], []>} : vector<1x128xf32>, vector<128x512xf32>, vector<1x512xf32> -> vector<1x512xf32>
    %217 = arith.addf %215, %216 : vector<1x512xf32>
    %218 = vector.extract_strided_slice %217 {offsets = [0, 0], sizes = [1, 128], strides = [1, 1]} : vector<1x512xf32> to vector<1x128xf32>
    %219 = arith.negf %218 : vector<1x128xf32>
    %220 = math.exp %219 : vector<1x128xf32>
    %cst_44 = arith.constant 1.000000e+00 : f32
    %221 = vector.broadcast %cst_44 : f32 to vector<1x128xf32>
    %222 = arith.addf %221, %220 : vector<1x128xf32>
    %223 = arith.divf %221, %222 : vector<1x128xf32>
    %224 = vector.extract_strided_slice %217 {offsets = [0, 128], sizes = [1, 128], strides = [1, 1]} : vector<1x512xf32> to vector<1x128xf32>
    %225 = arith.negf %224 : vector<1x128xf32>
    %226 = math.exp %225 : vector<1x128xf32>
    %cst_45 = arith.constant 1.000000e+00 : f32
    %227 = vector.broadcast %cst_45 : f32 to vector<1x128xf32>
    %228 = arith.addf %227, %226 : vector<1x128xf32>
    %229 = arith.divf %227, %228 : vector<1x128xf32>
    %230 = vector.extract_strided_slice %217 {offsets = [0, 256], sizes = [1, 128], strides = [1, 1]} : vector<1x512xf32> to vector<1x128xf32>
    %231 = math.tanh %230 : vector<1x128xf32>
    %232 = vector.extract_strided_slice %217 {offsets = [0, 384], sizes = [1, 128], strides = [1, 1]} : vector<1x512xf32> to vector<1x128xf32>
    %233 = arith.negf %232 : vector<1x128xf32>
    %234 = math.exp %233 : vector<1x128xf32>
    %cst_46 = arith.constant 1.000000e+00 : f32
    %235 = vector.broadcast %cst_46 : f32 to vector<1x128xf32>
    %236 = arith.addf %235, %234 : vector<1x128xf32>
    %237 = arith.divf %235, %236 : vector<1x128xf32>
    %238 = arith.mulf %229, %212 : vector<1x128xf32>
    %239 = arith.mulf %223, %231 : vector<1x128xf32>
    %240 = arith.addf %238, %239 : vector<1x128xf32>
    %241 = math.tanh %240 : vector<1x128xf32>
    %242 = arith.mulf %237, %241 : vector<1x128xf32>
    %c0_47 = arith.constant 0 : index
    %c0_48 = arith.constant 0 : index
    %243 = vector.load %arg6[%c0_47, %c0_48] : memref<128x12xf32, #tpu.memory_space<vmem>>, vector<128x12xf32>
    %cst_49 = arith.constant dense<0.000000e+00> : vector<1x12xf32>
    %244 = tpu.matmul %242, %243, %cst_49 {dimension_numbers = #tpu.dot_dimension_numbers<[1], [0], [0], [1], [0, 0, 1, 1], [], []>} : vector<1x128xf32>, vector<128x12xf32>, vector<1x12xf32> -> vector<1x12xf32>
    %c0_50 = arith.constant 0 : index
    %c0_51 = arith.constant 0 : index
    %245 = vector.load %arg7[%c0_50, %c0_51] : memref<1x12xf32, #tpu.memory_space<vmem>>, vector<1x12xf32>
    %246 = arith.addf %244, %245 : vector<1x12xf32>
    %c0_52 = arith.constant 0 : index
    %c0_53 = arith.constant 0 : index
    %c0_54 = arith.constant 0 : index
    %247 = vector.load %arg8[%c0_52, %c0_53, %c0_54] : memref<1x1x12xf32, #tpu.memory_space<vmem>>, vector<1x1x12xf32>
    %248 = vector.shape_cast %247 : vector<1x1x12xf32> to vector<1x12xf32>
    %249 = vector.shape_cast %246 : vector<1x12xf32> to vector<1x1x12xf32>
    tpu.vector_store %arg8[%c0_52, %c0_53, %c0_54], %249 {strides = array<i32>} : memref<1x1x12xf32, #tpu.memory_space<vmem>>, vector<1x1x12xf32>,
    return
  }
  func.func @transform_0(%arg0: i32) -> (i32, i32, i32) {
    %c0_i32 = arith.constant 0 : i32
    %c0_i32_0 = arith.constant 0 : i32
    %c0_i32_1 = arith.constant 0 : i32
    return %arg0, %c0_i32, %c0_i32_0 : i32, i32, i32
  }
  func.func @transform_1(%arg0: i32) -> (i32, i32) {
    %c0_i32 = arith.constant 0 : i32
    %c0_i32_0 = arith.constant 0 : i32
    %c0_i32_1 = arith.constant 0 : i32
    return %c0_i32, %c0_i32_0 : i32, i32
  }
  func.func @transform_2(%arg0: i32) -> (i32, i32) {
    %c0_i32 = arith.constant 0 : i32
    %c0_i32_0 = arith.constant 0 : i32
    %c0_i32_1 = arith.constant 0 : i32
    return %c0_i32, %c0_i32_0 : i32, i32
  }
  func.func @transform_3(%arg0: i32) -> (i32, i32) {
    %c0_i32 = arith.constant 0 : i32
    %c0_i32_0 = arith.constant 0 : i32
    %c0_i32_1 = arith.constant 0 : i32
    return %c0_i32, %c0_i32_0 : i32, i32
  }
  func.func @transform_4(%arg0: i32) -> (i32, i32) {
    %c0_i32 = arith.constant 0 : i32
    %c0_i32_0 = arith.constant 0 : i32
    %c0_i32_1 = arith.constant 0 : i32
    return %c0_i32, %c0_i32_0 : i32, i32
  }
  func.func @transform_5(%arg0: i32) -> (i32, i32) {
    %c0_i32 = arith.constant 0 : i32
    %c0_i32_0 = arith.constant 0 : i32
    %c0_i32_1 = arith.constant 0 : i32
    return %c0_i32, %c0_i32_0 : i32, i32
  }
  func.func @transform_6(%arg0: i32) -> (i32, i32) {
    %c0_i32 = arith.constant 0 : i32
    %c0_i32_0 = arith.constant 0 : i32
    %c0_i32_1 = arith.constant 0 : i32
    return %c0_i32, %c0_i32_0 : i32, i32
  }
  func.func @transform_7(%arg0: i32) -> (i32, i32, i32) {
    %c0_i32 = arith.constant 0 : i32
    %c0_i32_0 = arith.constant 0 : i32
    %c0_i32_1 = arith.constant 0 : i32
    return %arg0, %c0_i32, %c0_i32_0 : i32, i32, i32
  }
}

</mosaic_0001>

<bundles_post_ra>
// kernel: room_temperature_gnn_forward.1
= control target key start
LH: loop header
LB: loop body
LE: loop exit
PB: predicated region body
PF: predicated region fallthrough
CT: control target
= control target key end

     0   :  { %s3173_s24 = smov 0   ;;  %s3935_s0 = inlined_call_operand.vmem [shape: f32[2,8,32], index: 0, kind: input, shape index: {}]   ;;  %s3936_s1 = inlined_call_operand.vmem [shape: f32[32,32], index: 1, kind: input, shape index: {}]   ;;  %s3937_s2 = inlined_call_operand.vmem [shape: f32[32,512], index: 2, kind: input, shape index: {}]   ;;  %s3938_s3 = inlined_call_operand.vmem [shape: f32[1,512], index: 3, kind: input, shape index: {}]   ;;  %s3939_s4 = inlined_call_operand.vmem [shape: f32[128,512], index: 4, kind: input, shape index: {}]   ;;  %s3940_s5 = inlined_call_operand.vmem [shape: f32[128,12], index: 5, kind: input, shape index: {}]   ;;  %s3941_s6 = inlined_call_operand.vmem [shape: f32[1,12], index: 6, kind: input, shape index: {}]   ;;  %s3942_s7 = inlined_call_operand.vmem [shape: f32[2,1,12], index: 7, kind: output, shape index: {}]  }
   0x1 LB: > { %s2297_s25 = sadd.s32 4294967295, %s3128_s24   ;;  %p2301_p0 = scmp.ge.s32.totalorder %s3128_s24, 1  ;;  %s3128_s24 = sphi %s3173_s24, %s17_s24  }
   0x2   : > { %p236_p1 = scmp.lt.s32.totalorder %s3128_s24, 3 }
   0x4   : > { %p237_p2 = pnand %p2301_p0, %p236_p1 }
   0x5   : > { %v273_v0 = vld [vmem:[%s3936_s1] sm:$0xff] (!%p237_p2)  ;;  %v274_v1 = vld [vmem:[%s3936_s1 + $0x8] sm:$0xff] (!%p237_p2)  ;;  %v275_v2 = vld [vmem:[%s3936_s1 + $0x10] sm:$0xff] (!%p237_p2)  ;;  %v3130_v3 = vmov (!%p237_p2), 0.0|0.0   ;;  %vm3131_vm0 = vmmov (!%p237_p2), 0   ;;  %v3132_v6 = vmov (!%p237_p2), 0.0  }
   0x6   : > { %240 = sbr.rel (%p237_p2) target bundleno = 2792 (0xae8), region = 48  ;;  %2417 = vmatprep.subr.bf16.mxu1 (!%p237_p2), %v3130_v3  ;;  %v2418_v4 = vpack.c.bf16 (!%p237_p2), %v274_v1, %v273_v0  ;;  %v276_v5 = vld [vmem:[%s3936_s1 + $0x18] sm:$0xff] (!%p237_p2)  ;;  %2368 = vmatprep.mubr.msk.f32.mxu1 (!%p237_p2), %vm3131_vm0, %v3132_v6  ;;  %p265_p3 = scmp.lt.s32.totalorder (!%p237_p2), %s2297_s25, 1  ;;  %vm277_vm1 = vcmask (!%p237_p2), 261120   ;;  %v612_v9 = vld [vmem:[%s3939_s4 + $0x8] sm:$0xff] (!%p237_p2)  ;;  %v611_v11 = vld [vmem:[%s3939_s4] sm:$0xff] (!%p237_p2) }
   0x7   : > { %739 = vmatprep.mubr.f32.mxu0 (!%p237_p2), %v3132_v6  ;;  %v2421_v7 = vpack.c.bf16 (!%p237_p2), %v276_v5, %v275_v2  ;;  %v616_v10 = vld [vmem:[%s3939_s4 + $0x28] sm:$0xff] (!%p237_p2)  ;;  %v615_v13 = vld [vmem:[%s3939_s4 + $0x20] sm:$0xff] (!%p237_p2)  ;;  %vm2248_vm2 = vcmask (!%p237_p2), 90112  }
   0x8   : > { %2419 = vmatpush3.bf16.msra.mxu1 (!%p237_p2), %v2418_v4  ;;  %v3218_v12 = vpack.c.bf16 (!%p237_p2), %v616_v10, %v612_v9  ;;  %v620_v14 = vld [vmem:[%s3939_s4 + $0x48] sm:$0xff] (!%p237_p2)  ;;  %v3229_v16 = vpack.c.bf16 (!%p237_p2), %v615_v13, %v611_v11  ;;  %v619_v18 = vld [vmem:[%s3939_s4 + $0x40] sm:$0xff] (!%p237_p2)  ;;  %v435_v9 = vld [vmem:[%s3937_s2 + $0x38] sm:$0xff] (!%p237_p2) }
   0x9   : > { %2420 = vmatprep.subr.bf16.mxu1 (!%p237_p2), %v3130_v3  ;;  %v624_v15 = vld [vmem:[%s3939_s4 + $0x68] sm:$0xff] (!%p237_p2)  ;;  %v623_v19 = vld [vmem:[%s3939_s4 + $0x60] sm:$0xff] (!%p237_p2) }
   0xa   : > { %v3231_v17 = vpack.c.bf16 (!%p237_p2), %v624_v15, %v620_v14  ;;  %v628_v20 = vld [vmem:[%s3939_s4 + $0x88] sm:$0xff] (!%p237_p2)  ;;  %2446 = vmatprep.subr.bf16.mxu0 (!%p237_p2), %v3218_v12  ;;  %v3247_v22 = vpack.c.bf16 (!%p237_p2), %v623_v19, %v619_v18  ;;  %v627_v24 = vld [vmem:[%s3939_s4 + $0x80] sm:$0xff] (!%p237_p2) }
   0xb   : > { %v632_v21 = vld [vmem:[%s3939_s4 + $0xa8] sm:$0xff] (!%p237_p2)  ;;  %2448 = vmatpush1.bf16.msra.mxu0 (!%p237_p2), %v3229_v16  ;;  %v631_v25 = vld [vmem:[%s3939_s4 + $0xa0] sm:$0xff] (!%p237_p2) }
   0xc   : > { %2422 = vmatpush3.bf16.msra.mxu1 (!%p237_p2), %v2421_v7  ;;  %2450 = vmatprep.subr.bf16.mxu0 (!%p237_p2), %v3231_v17  ;;  %v3250_v23 = vpack.c.bf16 (!%p237_p2), %v632_v21, %v628_v20  ;;  %v636_v26 = vld [vmem:[%s3939_s4 + $0xc8] sm:$0xff] (!%p237_p2)  ;;  %v3265_v28 = vpack.c.bf16 (!%p237_p2), %v631_v25, %v627_v24  ;;  %v635_v30 = vld [vmem:[%s3939_s4 + $0xc0] sm:$0xff] (!%p237_p2)  ;;  %v430_v20 = vld [vmem:[%s3937_s2 + $0x10] sm:$0xff] (!%p237_p2) }
   0xd   : > { %s3944_s25 = smov (!%p265_p3, %s2297_s25), 1  ;;  %2423 = vmatprep.subr.bf16.mxu1 %v3130_v3  ;;  %v640_v27 = vld [vmem:[%s3939_s4 + $0xe8] sm:$0xff]  ;;  %v639_v31 = vld [vmem:[%s3939_s4 + $0xe0] sm:$0xff]  ;;  %v434_v21 = vld [vmem:[%s3937_s2 + $0x30] sm:$0xff] }
   0xe   : > { %s2302_s11 = sshll.u32 %s3944_s25, 3  ;;  %v3268_v29 = vpack.c.bf16 %v640_v27, %v636_v26  ;;  %v3277_v32 = vpack.c.bf16 %v639_v31, %v635_v30  ;;  %v644_v37 = vld [vmem:[%s3939_s4 + $0x108] sm:$0xff]  ;;  %v643_v40 = vld [vmem:[%s3939_s4 + $0x100] sm:$0xff]  ;;  %v439_v24 = vld [vmem:[%s3937_s2 + $0x58] sm:$0xff]  ;;  %v2439_v27 = vpack.c.bf16 %v434_v21, %v430_v20  ;;  %s271_s26 = scalar_lea.vmem %s3942_s7, %s3944_s25 }
   0xf   : > { %s268_s14 = scalar_lea.vmem %s3935_s0, %s2302_s11  ;;  %2452 = vmatpush1.bf16.msra.mxu0 %v3247_v22  ;;  %v648_v38 = vld [vmem:[%s3939_s4 + $0x128] sm:$0xff]  ;;  %v647_v41 = vld [vmem:[%s3939_s4 + $0x120] sm:$0xff]  ;;  %v443_v25 = vld [vmem:[%s3937_s2 + $0x78] sm:$0xff] }
  0x10   : > { %v272_v8 = vld [vmem:[%s268_s14] sm:$0xff]  ;;  %2454 = vmatprep.subr.bf16.mxu0 %v3250_v23  ;;  %v3293_v39 = vpack.c.bf16 %v648_v38, %v644_v37  ;;  %v3301_v42 = vpack.c.bf16 %v647_v41, %v643_v40  ;;  %v652_v43 = vld [vmem:[%s3939_s4 + $0x148] sm:$0xff]  ;;  %v2441_v31 = vpack.c.bf16 %v443_v25, %v439_v24  ;;  %v618_v37 = vld [vmem:[%s3939_s4 + $0x38] sm:$0xff] }
  0x11   : > { %2369 = vmatmul.mubr.msk.f32.vlgmr.msra.gmra.mrb[0].mxu1 %vm277_vm1, %v272_v8  ;;  %v656_v44 = vld [vmem:[%s3939_s4 + $0x168] sm:$0xff]  ;;  %v651_v48 = vld [vmem:[%s3939_s4 + $0x140] sm:$0xff]  ;;  %v613_v40 = vld [vmem:[%s3939_s4 + $0x10] sm:$0xff] }
  0x12   : > { %2425 = vmatpush3.bf16.msra.mxu1 %v2418_v4  ;;  %2379 = vmatprep.mubr.msk.f32.mxu1 %vm3131_vm0, %v3132_v6  ;;  %v429_v45 = vld [vmem:[%s3937_s2 + $0x8] sm:$0xff]  ;;  %v3314_v46 = vpack.c.bf16 %v656_v44, %v652_v43  ;;  %v655_v49 = vld [vmem:[%s3939_s4 + $0x160] sm:$0xff]  ;;  %v617_v41 = vld [vmem:[%s3939_s4 + $0x30] sm:$0xff] }
  0x13   : > { %2426 = vmatprep.subr.bf16.mxu1 %v3130_v3  ;;  %2456 = vmatpush1.bf16.msra.mxu0 %v3265_v28  ;;  %v433_v47 = vld [vmem:[%s3937_s2 + $0x28] sm:$0xff]  ;;  %v3325_v51 = vpack.c.bf16 %v655_v49, %v651_v48  ;;  %v428_v52 = vld [vmem:[%s3937_s2] sm:$0xff]  ;;  %v622_v43 = vld [vmem:[%s3939_s4 + $0x58] sm:$0xff] }
  0x14   : > { %2458 = vmatprep.subr.bf16.mxu0 %v3268_v29  ;;  %v2429_v50 = vpack.c.bf16 %v433_v47, %v429_v45  ;;  %v432_v53 = vld [vmem:[%s3937_s2 + $0x20] sm:$0xff]  ;;  %v660_v54 = vld [vmem:[%s3939_s4 + $0x188] sm:$0xff]  ;;  %v626_v44 = vld [vmem:[%s3939_s4 + $0x78] sm:$0xff]  ;;  %v3449_v45 = vpack.c.bf16 %v617_v41, %v613_v40 }
  0x15   : > { %v2431_v55 = vpack.c.bf16 %v432_v53, %v428_v52  ;;  %v664_v56 = vld [vmem:[%s3939_s4 + $0x1a8] sm:$0xff]  ;;  %v659_v61 = vld [vmem:[%s3939_s4 + $0x180] sm:$0xff]  ;;  %v3452_v47 = vpack.c.bf16 %v626_v44, %v622_v43  ;;  %v621_v48 = vld [vmem:[%s3939_s4 + $0x50] sm:$0xff]  ;;  %v446_v43 = vlaneseq }
  0x16   : > { %2428 = vmatpush3.bf16.msra.mxu1 %v2421_v7  ;;  %v437_v57 = vld [vmem:[%s3937_s2 + $0x48] sm:$0xff]  ;;  %v3347_v59 = vpack.c.bf16 %v664_v56, %v660_v54  ;;  %v663_v62 = vld [vmem:[%s3939_s4 + $0x1a0] sm:$0xff]  ;;  %v625_v49 = vld [vmem:[%s3939_s4 + $0x70] sm:$0xff] }
  0x17   : > { %2460 = vmatpush1.bf16.msra.mxu0 %v3277_v32  ;;  %v441_v58 = vld [vmem:[%s3937_s2 + $0x68] sm:$0xff]  ;;  %2430 = vmatprep.subr.bf16.mxu1 %v2429_v50  ;;  %v436_v63 = vld [vmem:[%s3937_s2 + $0x40] sm:$0xff]  ;;  %v3358_v0 = vpack.c.bf16 %v663_v62, %v659_v61  ;;  %v630_v50 = vld [vmem:[%s3939_s4 + $0x98] sm:$0xff]  ;;  %v3468_v53 = vpack.c.bf16 %v625_v49, %v621_v48  ;;  %v447_v44 = vshrl.u32 %v446_v43, 7 }
  0x18   : > { %2462 = vmatprep.subr.bf16.mxu0 %v3293_v39  ;;  %v2433_v60 = vpack.c.bf16 %v441_v58, %v437_v57  ;;  %v440_v1 = vld [vmem:[%s3937_s2 + $0x60] sm:$0xff]  ;;  %v668_v2 = vld [vmem:[%s3939_s4 + $0x1c8] sm:$0xff]  ;;  %v634_v52 = vld [vmem:[%s3939_s4 + $0xb8] sm:$0xff] }
  0x19   : > { %v672_v4 = vld [vmem:[%s3939_s4 + $0x1e8] sm:$0xff]  ;;  %v2435_v5 = vpack.c.bf16 %v440_v1, %v436_v63  ;;  %v667_v10 = vld [vmem:[%s3939_s4 + $0x1c0] sm:$0xff]  ;;  %v3472_v54 = vpack.c.bf16 %v634_v52, %v630_v50  ;;  %v633_v56 = vld [vmem:[%s3939_s4 + $0xb0] sm:$0xff]  ;;  %v452_v50 = vsub.s32 1, %v447_v44 }
  0x1a   : > { %v3370_v7 = vpack.c.bf16 %v672_v4, %v668_v2  ;;  %v671_v13 = vld [vmem:[%s3939_s4 + $0x1e0] sm:$0xff]  ;;  %v638_v57 = vld [vmem:[%s3939_s4 + $0xd8] sm:$0xff]  ;;  %v637_v62 = vld [vmem:[%s3939_s4 + $0xd0] sm:$0xff] }
  0x1b   : > { %2464 = vmatpush1.bf16.msra.mxu0 %v3301_v42  ;;  %v3385_v14 = vpack.c.bf16 %v671_v13, %v667_v10  ;;  %v642_v58 = vld [vmem:[%s3939_s4 + $0xf8] sm:$0xff]  ;;  %v641_v63 = vld [vmem:[%s3939_s4 + $0xf0] sm:$0xff]  ;;  %v444_v52 = vld [vmem:[%s3938_s3] sm:$0xf] }
  0x1c   : > { %2466 = vmatprep.subr.bf16.mxu0 %v3314_v46  ;;  %v3490_v61 = vpack.c.bf16 %v642_v58, %v638_v57  ;;  %v646_v1 = vld [vmem:[%s3939_s4 + $0x118] sm:$0xff]  ;;  %v3505_v4 = vpack.c.bf16 %v641_v63, %v637_v62 }
  0x1d   : > { %v650_v2 = vld [vmem:[%s3939_s4 + $0x138] sm:$0xff] }
  0x1e   : > { %v654_v10 = vld [vmem:[%s3939_s4 + $0x158] sm:$0xff] }
  0x1f   : > { %2468 = vmatpush1.bf16.msra.mxu0 %v3325_v51  ;;  %v662_v20 = vld [vmem:[%s3939_s4 + $0x198] sm:$0xff] }
  0x20   : > { %2470 = vmatprep.subr.bf16.mxu0 %v3347_v59  ;;  %v666_v21 = vld [vmem:[%s3939_s4 + $0x1b8] sm:$0xff] }
  0x21   : > { %v3544_v25 = vpack.c.bf16 %v666_v21, %v662_v20 }
  0x23   : > { %2472 = vmatpush1.bf16.msra.mxu0 %v3358_v0 }
  0x24   : > { %2474 = vmatprep.subr.bf16.mxu0 %v3370_v7 }
  0x27   : > { %2476 = vmatpush1.bf16.msra.mxu0 %v3385_v14 }
  0x28   : > { %2510 = vmatprep.subr.bf16.mxu0 %v3218_v12 }
  0x2a   : > { %740 = vmatmul.mubr.f32.vlgmr.msra.gmra.mrb[0].mxu0 %v3132_v6 }
  0x2b   : > { %2512 = vmatpush1.bf16.msra.mxu0 %v3229_v16  ;;  %909 = vmatprep.mubr.f32.mxu0 %v3132_v6 }
  0x2c   : > { %2514 = vmatprep.subr.bf16.mxu0 %v3231_v17 }
  0x2f   : > { %2516 = vmatpush1.bf16.msra.mxu0 %v3247_v22 }
  0x30   : > { %2518 = vmatprep.subr.bf16.mxu0 %v3250_v23 }
  0x33   : > { %2520 = vmatpush1.bf16.msra.mxu0 %v3265_v28 }
  0x34   : > { %2522 = vmatprep.subr.bf16.mxu0 %v3268_v29 }
  0x37   : > { %2524 = vmatpush1.bf16.msra.mxu0 %v3277_v32 }
  0x38   : > { %2526 = vmatprep.subr.bf16.mxu0 %v3293_v39 }
  0x3b   : > { %2528 = vmatpush1.bf16.msra.mxu0 %v3301_v42 }
  0x3c   : > { %2530 = vmatprep.subr.bf16.mxu0 %v3314_v46 }
  0x3f   : > { %2532 = vmatpush1.bf16.msra.mxu0 %v3325_v51 }
  0x40   : > { %2534 = vmatprep.subr.bf16.mxu0 %v3347_v59 }
  0x43   : > { %2536 = vmatpush1.bf16.msra.mxu0 %v3358_v0 }
  0x44   : > { %2538 = vmatprep.subr.bf16.mxu0 %v3370_v7 }
  0x47   : > { %2540 = vmatpush1.bf16.msra.mxu0 %v3385_v14 }
  0x48   : > { %2574 = vmatprep.subr.bf16.mxu0 %v3218_v12 }
  0xe4   : > { %v347_v33 = vpop.f32.mrb[0].mxu1 }
  0xe5   : > { %v3281_v34 = vsub.f32 %v272_v8, %v347_v33  ;;  %v2370_v35 = vpop.f32.mrb[1].mxu1  ;;  %v431_v8 = vld [vmem:[%s3937_s2 + $0x18] sm:$0xff]  ;;  %v438_v33 = vld [vmem:[%s3937_s2 + $0x50] sm:$0xff] }
  0xe6   : > { %v2437_v11 = vpack.c.bf16 %v435_v9, %v431_v8  ;;  %v442_v35 = vld [vmem:[%s3937_s2 + $0x70] sm:$0xff] }
  0xe7   : > { %v352_v36 = vmul.f32 %v3281_v34, %v3281_v34  ;;  %v645_v8 = vld [vmem:[%s3939_s4 + $0x110] sm:$0xff] }
  0xe8   : > { %v649_v9 = vld [vmem:[%s3939_s4 + $0x130] sm:$0xff] }
  0xe9   : > { %2380 = vmatmul.mubr.msk.f32.vlgmr.msra.gmra.mrb[2].mxu1 %vm277_vm1, %v352_v36  ;;  %v614_v36 = vld [vmem:[%s3939_s4 + $0x18] sm:$0xff]  ;;  %v3523_v13 = vpack.c.bf16 %v649_v9, %v645_v8 }
  0xea   : > { %533 = vmatprep.mubr.f32.mxu1 %v3132_v6  ;;  %2432 = vmatpush1.bf16.msra.mxu1 %v2431_v55  ;;  %v3435_v38 = vpack.c.bf16 %v618_v37, %v614_v36  ;;  %v629_v55 = vld [vmem:[%s3939_s4 + $0x90] sm:$0xff] }
  0xeb   : > { %2434 = vmatprep.subr.bf16.mxu1 %v2433_v60  ;;  %v3487_v60 = vpack.c.bf16 %v633_v56, %v629_v55  ;;  %v669_v36 = vld [vmem:[%s3939_s4 + $0x1d0] sm:$0xff]  ;;  %v448_v55 = vsub.s32 0, %v447_v44  ;;  %v453_v56 = vrot.slane %v444_v52, %v452_v50 }
  0xec   : > { %v673_v37 = vld [vmem:[%s3939_s4 + $0x1f0] sm:$0xff] }
  0xed   : > { %v449_v58 = vrot.slane %v444_v52, %v448_v55 }
  0xee   : > { %2436 = vmatpush1.bf16.msra.mxu1 %v2435_v5  ;;  %v3508_v5 = vpack.c.bf16 %v650_v2, %v646_v1 }
  0xef   : > { %2438 = vmatprep.subr.bf16.mxu1 %v2437_v11  ;;  %v658_v11 = vld [vmem:[%s3939_s4 + $0x178] sm:$0xff] }
  0xfd   : > { %v741_v40 = vpop.f32.mrb[0].mxu0 }
  0xfe   : > { %v743_v41 = vpop.f32.mrb[1].mxu0 }
 0x1bc   : > { %v422_v15 = vpop.f32.mrb[2].mxu1 }
 0x1bd   : > { %v423_v18 = vadd.f32 1e-05, %v422_v15  ;;  %v2381_v19 = vpop.f32.mrb[3].mxu1  ;;  %v3526_v15 = vpack.c.bf16 %v658_v11, %v654_v10  ;;  %v456_v11 = vsub.s32 2, %v447_v44 }
 0x1be   : > { %v657_v19 = vld [vmem:[%s3939_s4 + $0x170] sm:$0xff] }
 0x1bf   : > { %2992 = vrsqrt.f32 %v423_v18  ;;  %v653_v18 = vld [vmem:[%s3939_s4 + $0x150] sm:$0xff]  ;;  %v457_v21 = vrot.slane %v444_v52, %v456_v11 }
 0x1c0   : > { %v3541_v24 = vpack.c.bf16 %v657_v19, %v653_v18  ;;  %v460_v18 = vsub.s32 3, %v447_v44 }
 0x1c9   : > { %v2993_v26 = vpop.eup %2992 }
 0x1ca   : > { %v427_v30 = vmul.f32 %v2993_v26, %v3281_v34  ;;  %v2443_v34 = vpack.c.bf16 %v442_v35, %v438_v33  ;;  %v661_v26 = vld [vmem:[%s3939_s4 + $0x190] sm:$0xff] }
 0x1cc   : > { %2305 = vmatmul.mubr.msk.f32.vlgmr.msra.gmra.mrb[4].mxu1 %vm277_vm1, %v427_v30 }
 0x1cd   : > { %2440 = vmatpush1.bf16.msra.mxu1 %v2439_v27  ;;  %604 = vmatprep.mubr.f32.mxu1 %v3132_v6  ;;  %v665_v27 = vld [vmem:[%s3939_s4 + $0x1b0] sm:$0xff] }
 0x1ce   : > { %2442 = vmatprep.subr.bf16.mxu1 %v2441_v31  ;;  %v674_v31 = vld [vmem:[%s3939_s4 + $0x1f8] sm:$0xff]  ;;  %v3559_v33 = vpack.c.bf16 %v665_v27, %v661_v26  ;;  %v461_v26 = vrot.slane %v444_v52, %v460_v18 }
 0x1d1   : > { %2444 = vmatpush1.bf16.msra.mxu1 %v2443_v34  ;;  %v3571_v34 = vpack.c.bf16 %v673_v37, %v669_v36 }
 0x1d2   : > { %2478 = vmatprep.subr.bf16.mxu1 %v3435_v38 }
 0x1d4   : > { %2306 = vmatmul.mubr.msk.f32.vlgmr.msra.gmra.mrb[6].mxu1 %vm277_vm1, %v427_v30  ;;  %v670_v30 = vld [vmem:[%s3939_s4 + $0x1d8] sm:$0xff] }
 0x1d5   : > { %2480 = vmatpush1.bf16.msra.mxu1 %v3449_v45  ;;  %810 = vmatprep.mubr.f32.mxu1 %v3132_v6  ;;  %v3562_v35 = vpack.c.bf16 %v674_v31, %v670_v30 }
 0x1d6   : > { %2482 = vmatprep.subr.bf16.mxu1 %v3452_v47 }
 0x1d9   : > { %2484 = vmatpush1.bf16.msra.mxu1 %v3468_v53 }
 0x1da   : > { %2486 = vmatprep.subr.bf16.mxu1 %v3472_v54 }
 0x1dd   : > { %2488 = vmatpush1.bf16.msra.mxu1 %v3487_v60 }
 0x1de   : > { %2490 = vmatprep.subr.bf16.mxu1 %v3490_v61 }
 0x1e1   : > { %2492 = vmatpush1.bf16.msra.mxu1 %v3505_v4 }
 0x1e2   : > { %2494 = vmatprep.subr.bf16.mxu1 %v3508_v5 }
 0x1e5   : > { %2496 = vmatpush1.bf16.msra.mxu1 %v3523_v13 }
 0x1e6   : > { %2498 = vmatprep.subr.bf16.mxu1 %v3526_v15 }
 0x1e9   : > { %2500 = vmatpush1.bf16.msra.mxu1 %v3541_v24 }
 0x1ea   : > { %2502 = vmatprep.subr.bf16.mxu1 %v3544_v25 }
 0x1ed   : > { %2504 = vmatpush1.bf16.msra.mxu1 %v3559_v33 }
 0x1ee   : > { %2506 = vmatprep.subr.bf16.mxu1 %v3562_v35 }
 0x1f1   : > { %2508 = vmatpush1.bf16.msra.mxu1 %v3571_v34 }
 0x1f2   : > { %2542 = vmatprep.subr.bf16.mxu1 %v3435_v38 }
 0x1f4   : > { %811 = vmatmul.mubr.f32.vlgmr.msra.gmra.mrb[8].mxu1 %v3132_v6 }
 0x1f5   : > { %2544 = vmatpush1.bf16.msra.mxu1 %v3449_v45  ;;  %980 = vmatprep.mubr.f32.mxu1 %v3132_v6 }
 0x1f6   : > { %2546 = vmatprep.subr.bf16.mxu1 %v3452_v47 }
 0x1f9   : > { %2548 = vmatpush1.bf16.msra.mxu1 %v3468_v53 }
 0x1fa   : > { %2550 = vmatprep.subr.bf16.mxu1 %v3472_v54 }
 0x1fd   : > { %2552 = vmatpush1.bf16.msra.mxu1 %v3487_v60 }
 0x1fe   : > { %2554 = vmatprep.subr.bf16.mxu1 %v3490_v61 }
 0x201   : > { %2556 = vmatpush1.bf16.msra.mxu1 %v3505_v4 }
 0x202   : > { %2558 = vmatprep.subr.bf16.mxu1 %v3508_v5 }
 0x205   : > { %2560 = vmatpush1.bf16.msra.mxu1 %v3523_v13 }
 0x206   : > { %2562 = vmatprep.subr.bf16.mxu1 %v3526_v15 }
 0x209   : > { %2564 = vmatpush1.bf16.msra.mxu1 %v3541_v24 }
 0x20a   : > { %2566 = vmatprep.subr.bf16.mxu1 %v3544_v25 }
 0x20d   : > { %2568 = vmatpush1.bf16.msra.mxu1 %v3559_v33 }
 0x20e   : > { %2570 = vmatprep.subr.bf16.mxu1 %v3562_v35 }
 0x211   : > { %2572 = vmatpush1.bf16.msra.mxu1 %v3571_v34 }
 0x212   : > { %2606 = vmatprep.subr.bf16.mxu1 %v3435_v38 }
 0x29f   : > { %v535_v48 = vpop.f32.mrb[4].mxu1 }
 0x2a0   : > { %v537_v49 = vpop.f32.mrb[5].mxu1  ;;  %v3599_v1 = vadd.f32 %v535_v48, %v449_v58 }
 0x2a1   : > { %v3597_v63 = vadd.f32 %v537_v49, %v453_v56 }
 0x2a2   : > { %v817_v8 = vadd.f32 %v741_v40, %v3599_v1 }
 0x2a3   : > { %v818_v2 = vadd.f32 %v743_v41, %v3597_v63 }
 0x2a4   : > { %v2307_v10 = vmul.f32 -1.442695, %v817_v8 }
 0x2a5   : > { %v2308_v9 = vmul.f32 -1.442695, %v818_v2 }
 0x2a7   : > { %v606_v57 = vpop.f32.mrb[6].mxu1  ;;  %2994 = vpow2.f32 %v2308_v9 }
 0x2a8   : > { %v608_v62 = vpop.f32.mrb[7].mxu1  ;;  %2996 = vpow2.f32 %v2307_v10  ;;  %v3603_v31 = vadd.f32 %v606_v57, %v457_v21 }
 0x2a9   : > { %v3605_v36 = vadd.f32 %v608_v62, %v461_v26 }
 0x2b1   : > { %v2995_v19 = vpop.eup %2994 }
 0x2b2   : > { %v2997_v20 = vpop.eup %2996  ;;  %v830_v27 = vadd.f32 1.0, %v2995_v19 }
 0x2b3   : > { %v824_v30 = vadd.f32 1.0, %v2997_v20 }
 0x2b4   : > { %2998 = vrcp.f32 %v830_v27 }
 0x2b5   : > { %3000 = vrcp.f32 %v824_v30 }
 0x2be   : > { %v2999_v48 = vpop.eup %2998 }
 0x2bf   : > { %v3001_v49 = vpop.eup %3000  ;;  %v840_v52 = vmul.f32 0.0, %v2999_v48 }
 0x2c7   : > { %v812_v37 = vpop.f32.mrb[8].mxu1 }
 0x2c8   : > { %v819_v40 = vadd.f32 %v812_v37, %v3603_v31  ;;  %v814_v41 = vpop.f32.mrb[9].mxu1 }
 0x2c9   : > { %v820_v43 = vadd.f32 %v814_v41, %v3605_v36 }
 0x2ca   : > { %3002 = vtanh.f32 %v819_v40 }
 0x2cb   : > { %v2309_v44 = vmul.f32 -1.442695, %v820_v43 }
 0x2cd   : > { %3004 = vpow2.f32 %v2309_v44 }
 0x2d4   : > { %v3003_v50 = vpop.eup %3002 }
 0x2d5   : > { %v841_v55 = vmul.f32 %v3003_v50, %v3001_v49 }
 0x2d7   : > { %v3005_v56 = vpop.eup %3004  ;;  %v3609_v57 = vadd.f32 %v841_v55, %v840_v52 }
 0x2d8   : > { %v837_v58 = vadd.f32 1.0, %v3005_v56 }
 0x2d9   : > { %3006 = vtanh.f32 %v3609_v57 }
 0x2da   : > { %3008 = vrcp.f32 %v837_v58 }
 0x2e3   : > { %v3007_v62 = vpop.eup %3006 }
 0x2e4   : > { %v3009_v2 = vpop.eup %3008 }
 0x2e5   : > { %v844_v8 = vmul.f32 %v3009_v2, %v3007_v62  ;;  %v1023_v62 = vrot.slane %v3609_v57, 7 }
 0x2e7   : > { %910 = vmatmul.mubr.f32.vlgmr.msra.gmra.mrb[2].mxu0 %v844_v8  ;;  %981 = vmatmul.mubr.f32.vlgmr.msra.gmra.mrb[10].mxu1 %v844_v8 }
 0x2e8   : > { %2576 = vmatpush1.bf16.msra.mxu0 %v3229_v16  ;;  %2608 = vmatpush1.bf16.msra.mxu1 %v3449_v45 }
 0x2e9   : > { %2578 = vmatprep.subr.bf16.mxu0 %v3231_v17  ;;  %2610 = vmatprep.subr.bf16.mxu1 %v3452_v47 }
 0x2ea   : > { %1097 = vmatprep.mubr.f32.mxu0 %v3132_v6  ;;  %1168 = vmatprep.mubr.f32.mxu1 %v3132_v6 }
 0x2ec   : > { %2580 = vmatpush1.bf16.msra.mxu0 %v3247_v22  ;;  %2612 = vmatpush1.bf16.msra.mxu1 %v3468_v53 }
 0x2ed   : > { %2582 = vmatprep.subr.bf16.mxu0 %v3250_v23  ;;  %2614 = vmatprep.subr.bf16.mxu1 %v3472_v54 }
 0x2f0   : > { %2584 = vmatpush1.bf16.msra.mxu0 %v3265_v28  ;;  %2616 = vmatpush1.bf16.msra.mxu1 %v3487_v60 }
 0x2f1   : > { %2586 = vmatprep.subr.bf16.mxu0 %v3268_v29  ;;  %2618 = vmatprep.subr.bf16.mxu1 %v3490_v61 }
 0x2f4   : > { %2588 = vmatpush1.bf16.msra.mxu0 %v3277_v32  ;;  %2620 = vmatpush1.bf16.msra.mxu1 %v3505_v4 }
 0x2f5   : > { %2590 = vmatprep.subr.bf16.mxu0 %v3293_v39  ;;  %2622 = vmatprep.subr.bf16.mxu1 %v3508_v5 }
 0x2f8   : > { %2592 = vmatpush1.bf16.msra.mxu0 %v3301_v42  ;;  %2624 = vmatpush1.bf16.msra.mxu1 %v3523_v13 }
 0x2f9   : > { %2594 = vmatprep.subr.bf16.mxu0 %v3314_v46  ;;  %2626 = vmatprep.subr.bf16.mxu1 %v3526_v15 }
 0x2fc   : > { %2596 = vmatpush1.bf16.msra.mxu0 %v3325_v51  ;;  %2628 = vmatpush1.bf16.msra.mxu1 %v3541_v24 }
 0x2fd   : > { %2598 = vmatprep.subr.bf16.mxu0 %v3347_v59  ;;  %2630 = vmatprep.subr.bf16.mxu1 %v3544_v25 }
 0x300   : > { %2600 = vmatpush1.bf16.msra.mxu0 %v3358_v0  ;;  %2632 = vmatpush1.bf16.msra.mxu1 %v3559_v33 }
 0x301   : > { %2602 = vmatprep.subr.bf16.mxu0 %v3370_v7  ;;  %2634 = vmatprep.subr.bf16.mxu1 %v3562_v35 }
 0x304   : > { %2604 = vmatpush1.bf16.msra.mxu0 %v3385_v14  ;;  %2636 = vmatpush1.bf16.msra.mxu1 %v3571_v34 }
 0x305   : > { %2638 = vmatprep.subr.bf16.mxu0 %v3218_v12  ;;  %2670 = vmatprep.subr.bf16.mxu1 %v3435_v38 }
 0x3ba   : > { %v911_v9 = vpop.f32.mrb[2].mxu0  ;;  %v982_v10 = vpop.f32.mrb[10].mxu1 }
 0x3bb   : > { %v991_v11 = vrot.slane %v911_v9, 7  ;;  %v913_v18 = vpop.f32.mrb[3].mxu0  ;;  %v984_v19 = vpop.f32.mrb[11].mxu1  ;;  %v993_v41 = vrot.slane %v982_v10, 7 }
 0x3bc   : > { %v992_v20 = vrot.slane %v913_v18, 7  ;;  %v994_v37 = vrot.slane %v984_v19, 7 }
 0x3bd   : > { %v999_v21 = vadd.f32 %v991_v11, %v3599_v1  ;;  %v1001_v44 = vadd.f32 %v993_v41, %v3603_v31 }
 0x3be   : > { %v1000_v26 = vadd.f32 %v992_v20, %v3597_v63  ;;  %v1002_v40 = vadd.f32 %v994_v37, %v3605_v36 }
 0x3bf   : > { %v2310_v27 = vmul.f32 -1.442695, %v999_v21 }
 0x3c0   : > { %v2311_v30 = vmul.f32 -1.442695, %v1000_v26  ;;  %v2312_v43 = vmul.f32 -1.442695, %v1002_v40 }
 0x3c1   : > { %3010 = vpow2.f32 %v2310_v27 }
 0x3c2   : > { %3012 = vpow2.f32 %v2311_v30 }
 0x3c3   : > { %3014 = vpow2.f32 %v2312_v43 }
 0x3c4   : > { %3016 = vtanh.f32 %v1001_v44 }
 0x3cb   : > { %v3011_v48 = vpop.eup %3010 }
 0x3cc   : > { %v3013_v49 = vpop.eup %3012  ;;  %v1006_v50 = vadd.f32 1.0, %v3011_v48 }
 0x3cd   : > { %v1012_v52 = vadd.f32 1.0, %v3013_v49  ;;  %v3015_v55 = vpop.eup %3014 }
 0x3ce   : > { %3018 = vrcp.f32 %v1006_v50  ;;  %v3017_v56 = vpop.eup %3016  ;;  %v1019_v9 = vadd.f32 1.0, %v3015_v55 }
 0x3cf   : > { %3020 = vrcp.f32 %v1012_v52 }
 0x3d0   : > { %3022 = vrcp.f32 %v1019_v9 }
 0x3d8   : > { %v3019_v58 = vpop.eup %3018 }
 0x3d9   : > { %v3021_v2 = vpop.eup %3020  ;;  %v1026_v8 = vmul.f32 %v3019_v58, %v3017_v56 }
 0x3da   : > { %v1025_v10 = vmul.f32 %v3021_v2, %v1023_v62  ;;  %v3023_v18 = vpop.eup %3022 }
 0x3dc   : > { %v3651_v11 = vadd.f32 %v1026_v8, %v1025_v10 }
 0x3de   : > { %3024 = vtanh.f32 %v3651_v11 }
 0x3e8   : > { %v3025_v19 = vpop.eup %3024 }
 0x3e9   : > { %v1029_v20 = vmul.f32 %v3025_v19, %v3023_v18  ;;  %v1211_v19 = vrot.slane %v3651_v11, 7 }
 0x3eb   : > { %v1031_v21 = vrot.slane %v1029_v20, 1 }
 0x3ed   : > { %1098 = vmatmul.mubr.f32.vlgmr.msra.gmra.mrb[4].mxu0 %v1031_v21  ;;  %1169 = vmatmul.mubr.f32.vlgmr.msra.gmra.mrb[12].mxu1 %v1031_v21 }
 0x3ee   : > { %2640 = vmatpush1.bf16.msra.mxu0 %v3229_v16  ;;  %2672 = vmatpush1.bf16.msra.mxu1 %v3449_v45 }
 0x3ef   : > { %2642 = vmatprep.subr.bf16.mxu0 %v3231_v17  ;;  %2674 = vmatprep.subr.bf16.mxu1 %v3452_v47 }
 0x3f0   : > { %1285 = vmatprep.mubr.f32.mxu0 %v3132_v6  ;;  %1356 = vmatprep.mubr.f32.mxu1 %v3132_v6 }
 0x3f2   : > { %2644 = vmatpush1.bf16.msra.mxu0 %v3247_v22  ;;  %2676 = vmatpush1.bf16.msra.mxu1 %v3468_v53 }
 0x3f3   : > { %2646 = vmatprep.subr.bf16.mxu0 %v3250_v23  ;;  %2678 = vmatprep.subr.bf16.mxu1 %v3472_v54 }
 0x3f6   : > { %2648 = vmatpush1.bf16.msra.mxu0 %v3265_v28  ;;  %2680 = vmatpush1.bf16.msra.mxu1 %v3487_v60 }
 0x3f7   : > { %2650 = vmatprep.subr.bf16.mxu0 %v3268_v29  ;;  %2682 = vmatprep.subr.bf16.mxu1 %v3490_v61 }
 0x3fa   : > { %2652 = vmatpush1.bf16.msra.mxu0 %v3277_v32  ;;  %2684 = vmatpush1.bf16.msra.mxu1 %v3505_v4 }
 0x3fb   : > { %2654 = vmatprep.subr.bf16.mxu0 %v3293_v39  ;;  %2686 = vmatprep.subr.bf16.mxu1 %v3508_v5 }
 0x3fe   : > { %2656 = vmatpush1.bf16.msra.mxu0 %v3301_v42  ;;  %2688 = vmatpush1.bf16.msra.mxu1 %v3523_v13 }
 0x3ff   : > { %2658 = vmatprep.subr.bf16.mxu0 %v3314_v46  ;;  %2690 = vmatprep.subr.bf16.mxu1 %v3526_v15 }
 0x402   : > { %2660 = vmatpush1.bf16.msra.mxu0 %v3325_v51  ;;  %2692 = vmatpush1.bf16.msra.mxu1 %v3541_v24 }
 0x403   : > { %2662 = vmatprep.subr.bf16.mxu0 %v3347_v59  ;;  %2694 = vmatprep.subr.bf16.mxu1 %v3544_v25 }
 0x406   : > { %2664 = vmatpush1.bf16.msra.mxu0 %v3358_v0  ;;  %2696 = vmatpush1.bf16.msra.mxu1 %v3559_v33 }
 0x407   : > { %2666 = vmatprep.subr.bf16.mxu0 %v3370_v7  ;;  %2698 = vmatprep.subr.bf16.mxu1 %v3562_v35 }
 0x40a   : > { %2668 = vmatpush1.bf16.msra.mxu0 %v3385_v14  ;;  %2700 = vmatpush1.bf16.msra.mxu1 %v3571_v34 }
 0x40b   : > { %2702 = vmatprep.subr.bf16.mxu0 %v3218_v12  ;;  %2734 = vmatprep.subr.bf16.mxu1 %v3435_v38 }
 0x4c0   : > { %v1099_v57 = vpop.f32.mrb[4].mxu0  ;;  %v1170_v26 = vpop.f32.mrb[12].mxu1 }
 0x4c1   : > { %v1179_v27 = vrot.slane %v1099_v57, 6  ;;  %v1101_v30 = vpop.f32.mrb[5].mxu0  ;;  %v1172_v37 = vpop.f32.mrb[13].mxu1  ;;  %v1181_v52 = vrot.slane %v1170_v26, 6 }
 0x4c2   : > { %v1180_v40 = vrot.slane %v1101_v30, 6  ;;  %v1182_v49 = vrot.slane %v1172_v37, 6 }
 0x4c3   : > { %v1187_v41 = vadd.f32 %v1179_v27, %v3599_v1  ;;  %v1189_v56 = vadd.f32 %v1181_v52, %v3603_v31 }
 0x4c4   : > { %v1188_v43 = vadd.f32 %v1180_v40, %v3597_v63  ;;  %v1190_v50 = vadd.f32 %v1182_v49, %v3605_v36 }
 0x4c5   : > { %v2313_v44 = vmul.f32 -1.442695, %v1187_v41 }
 0x4c6   : > { %v2314_v48 = vmul.f32 -1.442695, %v1188_v43  ;;  %v2315_v55 = vmul.f32 -1.442695, %v1190_v50 }
 0x4c7   : > { %3026 = vpow2.f32 %v2313_v44 }
 0x4c8   : > { %3028 = vpow2.f32 %v2314_v48 }
 0x4c9   : > { %3030 = vpow2.f32 %v2315_v55 }
 0x4ca   : > { %3032 = vtanh.f32 %v1189_v56 }
 0x4d1   : > { %v3027_v58 = vpop.eup %3026 }
 0x4d2   : > { %v3029_v62 = vpop.eup %3028  ;;  %v1194_v2 = vadd.f32 1.0, %v3027_v58 }
 0x4d3   : > { %v1200_v8 = vadd.f32 1.0, %v3029_v62  ;;  %v3031_v9 = vpop.eup %3030 }
 0x4d4   : > { %3034 = vrcp.f32 %v1194_v2  ;;  %v3033_v10 = vpop.eup %3032  ;;  %v1207_v57 = vadd.f32 1.0, %v3031_v9 }
 0x4d5   : > { %3036 = vrcp.f32 %v1200_v8 }
 0x4d6   : > { %3038 = vrcp.f32 %v1207_v57 }
 0x4de   : > { %v3035_v18 = vpop.eup %3034 }
 0x4df   : > { %v3037_v20 = vpop.eup %3036  ;;  %v1214_v21 = vmul.f32 %v3035_v18, %v3033_v10 }
 0x4e0   : > { %v1213_v26 = vmul.f32 %v3037_v20, %v1211_v19  ;;  %v3039_v30 = vpop.eup %3038 }
 0x4e2   : > { %v3693_v27 = vadd.f32 %v1214_v21, %v1213_v26 }
 0x4e4   : > { %3040 = vtanh.f32 %v3693_v27 }
 0x4ee   : > { %v3041_v37 = vpop.eup %3040 }
 0x4ef   : > { %v1217_v40 = vmul.f32 %v3041_v37, %v3039_v30  ;;  %v1399_v37 = vrot.slane %v3693_v27, 7 }
 0x4f1   : > { %v1219_v41 = vrot.slane %v1217_v40, 2 }
 0x4f3   : > { %1286 = vmatmul.mubr.f32.vlgmr.msra.gmra.mrb[6].mxu0 %v1219_v41  ;;  %1357 = vmatmul.mubr.f32.vlgmr.msra.gmra.mrb[14].mxu1 %v1219_v41 }
 0x4f4   : > { %2704 = vmatpush1.bf16.msra.mxu0 %v3229_v16  ;;  %2736 = vmatpush1.bf16.msra.mxu1 %v3449_v45 }
 0x4f5   : > { %2706 = vmatprep.subr.bf16.mxu0 %v3231_v17  ;;  %2738 = vmatprep.subr.bf16.mxu1 %v3452_v47 }
 0x4f6   : > { %1473 = vmatprep.mubr.f32.mxu0 %v3132_v6  ;;  %1544 = vmatprep.mubr.f32.mxu1 %v3132_v6 }
 0x4f8   : > { %2708 = vmatpush1.bf16.msra.mxu0 %v3247_v22  ;;  %2740 = vmatpush1.bf16.msra.mxu1 %v3468_v53 }
 0x4f9   : > { %2710 = vmatprep.subr.bf16.mxu0 %v3250_v23  ;;  %2742 = vmatprep.subr.bf16.mxu1 %v3472_v54 }
 0x4fc   : > { %2712 = vmatpush1.bf16.msra.mxu0 %v3265_v28  ;;  %2744 = vmatpush1.bf16.msra.mxu1 %v3487_v60 }
 0x4fd   : > { %2714 = vmatprep.subr.bf16.mxu0 %v3268_v29  ;;  %2746 = vmatprep.subr.bf16.mxu1 %v3490_v61 }
 0x500   : > { %2716 = vmatpush1.bf16.msra.mxu0 %v3277_v32  ;;  %2748 = vmatpush1.bf16.msra.mxu1 %v3505_v4 }
 0x501   : > { %2718 = vmatprep.subr.bf16.mxu0 %v3293_v39  ;;  %2750 = vmatprep.subr.bf16.mxu1 %v3508_v5 }
 0x504   : > { %2720 = vmatpush1.bf16.msra.mxu0 %v3301_v42  ;;  %2752 = vmatpush1.bf16.msra.mxu1 %v3523_v13 }
 0x505   : > { %2722 = vmatprep.subr.bf16.mxu0 %v3314_v46  ;;  %2754 = vmatprep.subr.bf16.mxu1 %v3526_v15 }
 0x508   : > { %2724 = vmatpush1.bf16.msra.mxu0 %v3325_v51  ;;  %2756 = vmatpush1.bf16.msra.mxu1 %v3541_v24 }
 0x509   : > { %2726 = vmatprep.subr.bf16.mxu0 %v3347_v59  ;;  %2758 = vmatprep.subr.bf16.mxu1 %v3544_v25 }
 0x50c   : > { %2728 = vmatpush1.bf16.msra.mxu0 %v3358_v0  ;;  %2760 = vmatpush1.bf16.msra.mxu1 %v3559_v33 }
 0x50d   : > { %2730 = vmatprep.subr.bf16.mxu0 %v3370_v7  ;;  %2762 = vmatprep.subr.bf16.mxu1 %v3562_v35 }
 0x510   : > { %2732 = vmatpush1.bf16.msra.mxu0 %v3385_v14  ;;  %2764 = vmatpush1.bf16.msra.mxu1 %v3571_v34 }
 0x511   : > { %2766 = vmatprep.subr.bf16.mxu0 %v3218_v12  ;;  %2798 = vmatprep.subr.bf16.mxu1 %v3435_v38 }
 0x5c6   : > { %v1287_v11 = vpop.f32.mrb[6].mxu0  ;;  %v1358_v43 = vpop.f32.mrb[14].mxu1 }
 0x5c7   : > { %v1367_v44 = vrot.slane %v1287_v11, 5  ;;  %v1289_v48 = vpop.f32.mrb[7].mxu0  ;;  %v1360_v49 = vpop.f32.mrb[15].mxu1  ;;  %v1369_v8 = vrot.slane %v1358_v43, 5 }
 0x5c8   : > { %v1368_v50 = vrot.slane %v1289_v48, 5  ;;  %v1370_v62 = vrot.slane %v1360_v49, 5 }
 0x5c9   : > { %v1375_v52 = vadd.f32 %v1367_v44, %v3599_v1  ;;  %v1377_v10 = vadd.f32 %v1369_v8, %v3603_v31 }
 0x5ca   : > { %v1376_v55 = vadd.f32 %v1368_v50, %v3597_v63  ;;  %v1378_v2 = vadd.f32 %v1370_v62, %v3605_v36 }
 0x5cb   : > { %v2316_v56 = vmul.f32 -1.442695, %v1375_v52 }
 0x5cc   : > { %v2317_v58 = vmul.f32 -1.442695, %v1376_v55  ;;  %v2318_v9 = vmul.f32 -1.442695, %v1378_v2 }
 0x5cd   : > { %3042 = vpow2.f32 %v2316_v56 }
 0x5ce   : > { %3044 = vpow2.f32 %v2317_v58 }
 0x5cf   : > { %3046 = vpow2.f32 %v2318_v9 }
 0x5d0   : > { %3048 = vtanh.f32 %v1377_v10 }
 0x5d7   : > { %v3043_v18 = vpop.eup %3042 }
 0x5d8   : > { %v3045_v19 = vpop.eup %3044  ;;  %v1382_v20 = vadd.f32 1.0, %v3043_v18 }
 0x5d9   : > { %v1388_v21 = vadd.f32 1.0, %v3045_v19  ;;  %v3047_v57 = vpop.eup %3046 }
 0x5da   : > { %3050 = vrcp.f32 %v1382_v20  ;;  %v3049_v26 = vpop.eup %3048  ;;  %v1395_v11 = vadd.f32 1.0, %v3047_v57 }
 0x5db   : > { %3052 = vrcp.f32 %v1388_v21 }
 0x5dc   : > { %3054 = vrcp.f32 %v1395_v11 }
 0x5e4   : > { %v3051_v30 = vpop.eup %3050 }
 0x5e5   : > { %v3053_v40 = vpop.eup %3052  ;;  %v1402_v41 = vmul.f32 %v3051_v30, %v3049_v26 }
 0x5e6   : > { %v1401_v43 = vmul.f32 %v3053_v40, %v1399_v37  ;;  %v3055_v48 = vpop.eup %3054 }
 0x5e8   : > { %v3735_v44 = vadd.f32 %v1402_v41, %v1401_v43 }
 0x5ea   : > { %3056 = vtanh.f32 %v3735_v44 }
 0x5f4   : > { %v3057_v49 = vpop.eup %3056 }
 0x5f5   : > { %v1405_v50 = vmul.f32 %v3057_v49, %v3055_v48  ;;  %v1587_v49 = vrot.slane %v3735_v44, 7 }
 0x5f7   : > { %v1407_v52 = vrot.slane %v1405_v50, 3 }
 0x5f9   : > { %1474 = vmatmul.mubr.f32.vlgmr.msra.gmra.mrb[8].mxu0 %v1407_v52  ;;  %1545 = vmatmul.mubr.f32.vlgmr.msra.gmra.mrb[16].mxu1 %v1407_v52 }
 0x5fa   : > { %2768 = vmatpush1.bf16.msra.mxu0 %v3229_v16  ;;  %2800 = vmatpush1.bf16.msra.mxu1 %v3449_v45 }
 0x5fb   : > { %2770 = vmatprep.subr.bf16.mxu0 %v3231_v17  ;;  %2802 = vmatprep.subr.bf16.mxu1 %v3452_v47 }
 0x5fc   : > { %1661 = vmatprep.mubr.f32.mxu0 %v3132_v6  ;;  %1732 = vmatprep.mubr.f32.mxu1 %v3132_v6 }
 0x5fe   : > { %2772 = vmatpush1.bf16.msra.mxu0 %v3247_v22  ;;  %2804 = vmatpush1.bf16.msra.mxu1 %v3468_v53 }
 0x5ff   : > { %2774 = vmatprep.subr.bf16.mxu0 %v3250_v23  ;;  %2806 = vmatprep.subr.bf16.mxu1 %v3472_v54 }
 0x602   : > { %2776 = vmatpush1.bf16.msra.mxu0 %v3265_v28  ;;  %2808 = vmatpush1.bf16.msra.mxu1 %v3487_v60 }
 0x603   : > { %2778 = vmatprep.subr.bf16.mxu0 %v3268_v29  ;;  %2810 = vmatprep.subr.bf16.mxu1 %v3490_v61 }
 0x606   : > { %2780 = vmatpush1.bf16.msra.mxu0 %v3277_v32  ;;  %2812 = vmatpush1.bf16.msra.mxu1 %v3505_v4 }
 0x607   : > { %2782 = vmatprep.subr.bf16.mxu0 %v3293_v39  ;;  %2814 = vmatprep.subr.bf16.mxu1 %v3508_v5 }
 0x60a   : > { %2784 = vmatpush1.bf16.msra.mxu0 %v3301_v42  ;;  %2816 = vmatpush1.bf16.msra.mxu1 %v3523_v13 }
 0x60b   : > { %2786 = vmatprep.subr.bf16.mxu0 %v3314_v46  ;;  %2818 = vmatprep.subr.bf16.mxu1 %v3526_v15 }
 0x60e   : > { %2788 = vmatpush1.bf16.msra.mxu0 %v3325_v51  ;;  %2820 = vmatpush1.bf16.msra.mxu1 %v3541_v24 }
 0x60f   : > { %2790 = vmatprep.subr.bf16.mxu0 %v3347_v59  ;;  %2822 = vmatprep.subr.bf16.mxu1 %v3544_v25 }
 0x612   : > { %2792 = vmatpush1.bf16.msra.mxu0 %v3358_v0  ;;  %2824 = vmatpush1.bf16.msra.mxu1 %v3559_v33 }
 0x613   : > { %2794 = vmatprep.subr.bf16.mxu0 %v3370_v7  ;;  %2826 = vmatprep.subr.bf16.mxu1 %v3562_v35 }
 0x616   : > { %2796 = vmatpush1.bf16.msra.mxu0 %v3385_v14  ;;  %2828 = vmatpush1.bf16.msra.mxu1 %v3571_v34 }
 0x617   : > { %2830 = vmatprep.subr.bf16.mxu0 %v3218_v12  ;;  %2862 = vmatprep.subr.bf16.mxu1 %v3435_v38 }
 0x6cc   : > { %v1475_v27 = vpop.f32.mrb[8].mxu0  ;;  %v1546_v55 = vpop.f32.mrb[16].mxu1 }
 0x6cd   : > { %v1555_v56 = vrot.slane %v1475_v27, 4  ;;  %v1477_v58 = vpop.f32.mrb[9].mxu0  ;;  %v1548_v62 = vpop.f32.mrb[17].mxu1  ;;  %v1557_v21 = vrot.slane %v1546_v55, 4 }
 0x6ce   : > { %v1556_v2 = vrot.slane %v1477_v58, 4  ;;  %v1558_v19 = vrot.slane %v1548_v62, 4 }
 0x6cf   : > { %v1563_v8 = vadd.f32 %v1555_v56, %v3599_v1  ;;  %v1565_v26 = vadd.f32 %v1557_v21, %v3603_v31 }
 0x6d0   : > { %v1564_v9 = vadd.f32 %v1556_v2, %v3597_v63  ;;  %v1566_v20 = vadd.f32 %v1558_v19, %v3605_v36 }
 0x6d1   : > { %v2319_v10 = vmul.f32 -1.442695, %v1563_v8 }
 0x6d2   : > { %v2320_v18 = vmul.f32 -1.442695, %v1564_v9  ;;  %v2321_v57 = vmul.f32 -1.442695, %v1566_v20 }
 0x6d3   : > { %3058 = vpow2.f32 %v2319_v10 }
 0x6d4   : > { %3060 = vpow2.f32 %v2320_v18 }
 0x6d5   : > { %3062 = vpow2.f32 %v2321_v57 }
 0x6d6   : > { %3064 = vtanh.f32 %v1565_v26 }
 0x6dd   : > { %v3059_v30 = vpop.eup %3058 }
 0x6de   : > { %v3061_v37 = vpop.eup %3060  ;;  %v1570_v40 = vadd.f32 1.0, %v3059_v30 }
 0x6df   : > { %v1576_v41 = vadd.f32 1.0, %v3061_v37  ;;  %v3063_v11 = vpop.eup %3062 }
 0x6e0   : > { %3066 = vrcp.f32 %v1570_v40  ;;  %v3065_v43 = vpop.eup %3064  ;;  %v1583_v27 = vadd.f32 1.0, %v3063_v11 }
 0x6e1   : > { %3068 = vrcp.f32 %v1576_v41 }
 0x6e2   : > { %3070 = vrcp.f32 %v1583_v27 }
 0x6ea   : > { %v3067_v48 = vpop.eup %3066 }
 0x6eb   : > { %v3069_v50 = vpop.eup %3068  ;;  %v1590_v52 = vmul.f32 %v3067_v48, %v3065_v43 }
 0x6ec   : > { %v1589_v55 = vmul.f32 %v3069_v50, %v1587_v49  ;;  %v3071_v58 = vpop.eup %3070 }
 0x6ee   : > { %v3777_v56 = vadd.f32 %v1590_v52, %v1589_v55 }
 0x6f0   : > { %3072 = vtanh.f32 %v3777_v56  ;;  %v1775_v55 = vrot.slane %v3777_v56, 7 }
 0x6fa   : > { %v3073_v62 = vpop.eup %3072 }
 0x6fb   : > { %v1593_v2 = vmul.f32 %v3073_v62, %v3071_v58 }
 0x6fd   : > { %v1595_v8 = vrot.slane %v1593_v2, 4 }
 0x6ff   : > { %1662 = vmatmul.mubr.f32.vlgmr.msra.gmra.mrb[10].mxu0 %v1595_v8  ;;  %1733 = vmatmul.mubr.f32.vlgmr.msra.gmra.mrb[18].mxu1 %v1595_v8 }
 0x700   : > { %2832 = vmatpush1.bf16.msra.mxu0 %v3229_v16  ;;  %2864 = vmatpush1.bf16.msra.mxu1 %v3449_v45 }
 0x701   : > { %2834 = vmatprep.subr.bf16.mxu0 %v3231_v17  ;;  %2866 = vmatprep.subr.bf16.mxu1 %v3452_v47 }
 0x702   : > { %1849 = vmatprep.mubr.f32.mxu0 %v3132_v6  ;;  %1920 = vmatprep.mubr.f32.mxu1 %v3132_v6 }
 0x704   : > { %2836 = vmatpush1.bf16.msra.mxu0 %v3247_v22  ;;  %2868 = vmatpush1.bf16.msra.mxu1 %v3468_v53 }
 0x705   : > { %2838 = vmatprep.subr.bf16.mxu0 %v3250_v23  ;;  %2870 = vmatprep.subr.bf16.mxu1 %v3472_v54 }
 0x708   : > { %2840 = vmatpush1.bf16.msra.mxu0 %v3265_v28  ;;  %2872 = vmatpush1.bf16.msra.mxu1 %v3487_v60 }
 0x709   : > { %2842 = vmatprep.subr.bf16.mxu0 %v3268_v29  ;;  %2874 = vmatprep.subr.bf16.mxu1 %v3490_v61 }
 0x70c   : > { %2844 = vmatpush1.bf16.msra.mxu0 %v3277_v32  ;;  %2876 = vmatpush1.bf16.msra.mxu1 %v3505_v4 }
 0x70d   : > { %2846 = vmatprep.subr.bf16.mxu0 %v3293_v39  ;;  %2878 = vmatprep.subr.bf16.mxu1 %v3508_v5 }
 0x710   : > { %2848 = vmatpush1.bf16.msra.mxu0 %v3301_v42  ;;  %2880 = vmatpush1.bf16.msra.mxu1 %v3523_v13 }
 0x711   : > { %2850 = vmatprep.subr.bf16.mxu0 %v3314_v46  ;;  %2882 = vmatprep.subr.bf16.mxu1 %v3526_v15 }
 0x714   : > { %2852 = vmatpush1.bf16.msra.mxu0 %v3325_v51  ;;  %2884 = vmatpush1.bf16.msra.mxu1 %v3541_v24 }
 0x715   : > { %2854 = vmatprep.subr.bf16.mxu0 %v3347_v59  ;;  %2886 = vmatprep.subr.bf16.mxu1 %v3544_v25 }
 0x718   : > { %2856 = vmatpush1.bf16.msra.mxu0 %v3358_v0  ;;  %2888 = vmatpush1.bf16.msra.mxu1 %v3559_v33 }
 0x719   : > { %2858 = vmatprep.subr.bf16.mxu0 %v3370_v7  ;;  %2890 = vmatprep.subr.bf16.mxu1 %v3562_v35 }
 0x71c   : > { %2860 = vmatpush1.bf16.msra.mxu0 %v3385_v14  ;;  %2892 = vmatpush1.bf16.msra.mxu1 %v3571_v34 }
 0x71d   : > { %2894 = vmatprep.subr.bf16.mxu0 %v3218_v12  ;;  %2926 = vmatprep.subr.bf16.mxu1 %v3435_v38 }
 0x7d2   : > { %v1663_v44 = vpop.f32.mrb[10].mxu0  ;;  %v1734_v9 = vpop.f32.mrb[18].mxu1 }
 0x7d3   : > { %v1743_v10 = vrot.slane %v1663_v44, 3  ;;  %v1665_v18 = vpop.f32.mrb[11].mxu0  ;;  %v1736_v19 = vpop.f32.mrb[19].mxu1  ;;  %v1745_v12 = vrot.slane %v1734_v9, 3 }
 0x7d4   : > { %v1744_v20 = vrot.slane %v1665_v18, 3  ;;  %v1746_v37 = vrot.slane %v1736_v19, 3 }
 0x7d5   : > { %v1751_v21 = vadd.f32 %v1743_v10, %v3599_v1  ;;  %v1753_v38 = vadd.f32 %v1745_v12, %v3603_v31  ;;  %v2163_v12 = vld [vmem:[%s3940_s5 + $0x28] sm:$0xff] }
 0x7d6   : > { %v1752_v57 = vadd.f32 %v1744_v20, %v3597_v63  ;;  %v1754_v40 = vadd.f32 %v1746_v37, %v3605_v36 }
 0x7d7   : > { %v2322_v26 = vmul.f32 -1.442695, %v1751_v21  ;;  %v2158_v21 = vld [vmem:[%s3940_s5] sm:$0xff] }
 0x7d8   : > { %v2323_v30 = vmul.f32 -1.442695, %v1752_v57  ;;  %v2324_v41 = vmul.f32 -1.442695, %v1754_v40  ;;  %v2159_v57 = vld [vmem:[%s3940_s5 + $0x8] sm:$0xff]  ;;  %v2162_v40 = vld [vmem:[%s3940_s5 + $0x20] sm:$0xff] }
 0x7d9   : > { %3074 = vpow2.f32 %v2322_v26  ;;  %v2958_v26 = vpack.c.bf16 %v2159_v57, %v2158_v21 }
 0x7da   : > { %3076 = vpow2.f32 %v2323_v30  ;;  %v2160_v30 = vld [vmem:[%s3940_s5 + $0x10] sm:$0xff] }
 0x7db   : > { %3078 = vpow2.f32 %v2324_v41  ;;  %v2964_v41 = vpack.c.bf16 %v2163_v12, %v2162_v40 }
 0x7dc   : > { %3080 = vtanh.f32 %v1753_v38  ;;  %v2164_v38 = vld [vmem:[%s3940_s5 + $0x30] sm:$0xff] }
 0x7e3   : > { %v3075_v11 = vpop.eup %3074 }
 0x7e4   : > { %v3077_v43 = vpop.eup %3076  ;;  %v1758_v48 = vadd.f32 1.0, %v3075_v11  ;;  %v2165_v11 = vld [vmem:[%s3940_s5 + $0x38] sm:$0xff] }
 0x7e5   : > { %v1764_v49 = vadd.f32 1.0, %v3077_v43  ;;  %v3079_v50 = vpop.eup %3078  ;;  %v2967_v43 = vpack.c.bf16 %v2165_v11, %v2164_v38 }
 0x7e6   : > { %3082 = vrcp.f32 %v1758_v48  ;;  %v3081_v52 = vpop.eup %3080  ;;  %v1771_v2 = vadd.f32 1.0, %v3079_v50  ;;  %v2166_v48 = vld [vmem:[%s3940_s5 + $0x40] sm:$0xff] }
 0x7e7   : > { %3084 = vrcp.f32 %v1764_v49  ;;  %v2167_v49 = vld [vmem:[%s3940_s5 + $0x48] sm:$0xff] }
 0x7e8   : > { %3086 = vrcp.f32 %v1771_v2  ;;  %v2970_v50 = vpack.c.bf16 %v2167_v49, %v2166_v48 }
 0x7f0   : > { %v3083_v27 = vpop.eup %3082 }
 0x7f1   : > { %v3085_v58 = vpop.eup %3084  ;;  %v1778_v62 = vmul.f32 %v3083_v27, %v3081_v52  ;;  %v2168_v52 = vld [vmem:[%s3940_s5 + $0x50] sm:$0xff]  ;;  %v2169_v27 = vld [vmem:[%s3940_s5 + $0x58] sm:$0xff] }
 0x7f2   : > { %v1777_v8 = vmul.f32 %v3085_v58, %v1775_v55  ;;  %v3087_v9 = vpop.eup %3086  ;;  %v2973_v55 = vpack.c.bf16 %v2169_v27, %v2168_v52  ;;  %v2170_v58 = vld [vmem:[%s3940_s5 + $0x60] sm:$0xff] }
 0x7f4   : > { %v3819_v44 = vadd.f32 %v1778_v62, %v1777_v8  ;;  %v2171_v62 = vld [vmem:[%s3940_s5 + $0x68] sm:$0xff]  ;;  %v2172_v8 = vld [vmem:[%s3940_s5 + $0x70] sm:$0xff] }
 0x7f5   : > { %v2976_v2 = vpack.c.bf16 %v2171_v62, %v2170_v58 }
 0x7f6   : > { %3088 = vtanh.f32 %v3819_v44 }
 0x800   : > { %v3089_v10 = vpop.eup %3088 }
 0x801   : > { %v1781_v18 = vmul.f32 %v3089_v10, %v3087_v9 }
 0x803   : > { %v1783_v19 = vrot.slane %v1781_v18, 5 }
 0x805   : > { %1850 = vmatmul.mubr.f32.vlgmr.msra.gmra.mrb[12].mxu0 %v1783_v19  ;;  %1921 = vmatmul.mubr.f32.vlgmr.msra.gmra.mrb[20].mxu1 %v1783_v19 }
 0x806   : > { %2896 = vmatpush1.bf16.msra.mxu0 %v3229_v16  ;;  %2928 = vmatpush1.bf16.msra.mxu1 %v3449_v45 }
 0x807   : > { %2898 = vmatprep.subr.bf16.mxu0 %v3231_v17  ;;  %2930 = vmatprep.subr.bf16.mxu1 %v3452_v47 }
 0x808   : > { %2037 = vmatprep.mubr.f32.mxu0 %v3132_v6  ;;  %2108 = vmatprep.mubr.f32.mxu1 %v3132_v6 }
 0x80a   : > { %2900 = vmatpush1.bf16.msra.mxu0 %v3247_v22  ;;  %2932 = vmatpush1.bf16.msra.mxu1 %v3468_v53 }
 0x80b   : > { %2902 = vmatprep.subr.bf16.mxu0 %v3250_v23  ;;  %2934 = vmatprep.subr.bf16.mxu1 %v3472_v54 }
 0x80e   : > { %2904 = vmatpush1.bf16.msra.mxu0 %v3265_v28  ;;  %2936 = vmatpush1.bf16.msra.mxu1 %v3487_v60 }
 0x80f   : > { %2906 = vmatprep.subr.bf16.mxu0 %v3268_v29  ;;  %2938 = vmatprep.subr.bf16.mxu1 %v3490_v61 }
 0x812   : > { %2908 = vmatpush1.bf16.msra.mxu0 %v3277_v32  ;;  %2940 = vmatpush1.bf16.msra.mxu1 %v3505_v4 }
 0x813   : > { %2910 = vmatprep.subr.bf16.mxu0 %v3293_v39  ;;  %2942 = vmatprep.subr.bf16.mxu1 %v3508_v5  ;;  %v1963_v5 = vrot.slane %v3819_v44, 7  ;;  %v2173_v44 = vld [vmem:[%s3940_s5 + $0x78] sm:$0xff] }
 0x814   : > { %v2979_v9 = vpack.c.bf16 %v2173_v44, %v2172_v8 }
 0x816   : > { %2912 = vmatpush1.bf16.msra.mxu0 %v3301_v42  ;;  %2944 = vmatpush1.bf16.msra.mxu1 %v3523_v13 }
 0x817   : > { %2914 = vmatprep.subr.bf16.mxu0 %v3314_v46  ;;  %2946 = vmatprep.subr.bf16.mxu1 %v3526_v15 }
 0x81a   : > { %2916 = vmatpush1.bf16.msra.mxu0 %v3325_v51  ;;  %2948 = vmatpush1.bf16.msra.mxu1 %v3541_v24 }
 0x81b   : > { %2918 = vmatprep.subr.bf16.mxu0 %v3347_v59  ;;  %2950 = vmatprep.subr.bf16.mxu1 %v3544_v25 }
 0x81e   : > { %2920 = vmatpush1.bf16.msra.mxu0 %v3358_v0  ;;  %2952 = vmatpush1.bf16.msra.mxu1 %v3559_v33 }
 0x81f   : > { %2922 = vmatprep.subr.bf16.mxu0 %v3370_v7  ;;  %2954 = vmatprep.subr.bf16.mxu1 %v3562_v35 }
 0x822   : > { %2924 = vmatpush1.bf16.msra.mxu0 %v3385_v14  ;;  %2956 = vmatpush1.bf16.msra.mxu1 %v3571_v34 }
 0x823   : > { %2957 = vmatprep.subr.bf16.mxu0 %v3130_v3 }
 0x8d8   : > { %v1851_v16 = vpop.f32.mrb[12].mxu0  ;;  %v1922_v17 = vpop.f32.mrb[20].mxu1 }
 0x8d9   : > { %v1931_v22 = vrot.slane %v1851_v16, 2  ;;  %v1853_v23 = vpop.f32.mrb[13].mxu0  ;;  %v1924_v28 = vpop.f32.mrb[21].mxu1  ;;  %v1933_v0 = vrot.slane %v1922_v17, 2 }
 0x8da   : > { %v1932_v29 = vrot.slane %v1853_v23, 2  ;;  %v1934_v51 = vrot.slane %v1924_v28, 2 }
 0x8db   : > { %v1939_v32 = vadd.f32 %v1931_v22, %v3599_v1  ;;  %v1941_v14 = vadd.f32 %v1933_v0, %v3603_v31 }
 0x8dc   : > { %v1940_v39 = vadd.f32 %v1932_v29, %v3597_v63  ;;  %v1942_v59 = vadd.f32 %v1934_v51, %v3605_v36 }
 0x8dd   : > { %v2325_v42 = vmul.f32 -1.442695, %v1939_v32 }
 0x8de   : > { %v2326_v46 = vmul.f32 -1.442695, %v1940_v39  ;;  %v2327_v7 = vmul.f32 -1.442695, %v1942_v59 }
 0x8df   : > { %3090 = vpow2.f32 %v2325_v42 }
 0x8e0   : > { %3092 = vpow2.f32 %v2326_v46 }
 0x8e1   : > { %3094 = vpow2.f32 %v2327_v7 }
 0x8e2   : > { %3096 = vtanh.f32 %v1941_v14 }
 0x8e9   : > { %v3091_v45 = vpop.eup %3090 }
 0x8ea   : > { %v3093_v47 = vpop.eup %3092  ;;  %v1946_v53 = vadd.f32 1.0, %v3091_v45 }
 0x8eb   : > { %v1952_v54 = vadd.f32 1.0, %v3093_v47  ;;  %v3095_v60 = vpop.eup %3094 }
 0x8ec   : > { %3098 = vrcp.f32 %v1946_v53  ;;  %v3097_v61 = vpop.eup %3096  ;;  %v1959_v24 = vadd.f32 1.0, %v3095_v60 }
 0x8ed   : > { %3100 = vrcp.f32 %v1952_v54 }
 0x8ee   : > { %3102 = vrcp.f32 %v1959_v24 }
 0x8f6   : > { %v3099_v4 = vpop.eup %3098 }
 0x8f7   : > { %v3101_v13 = vpop.eup %3100  ;;  %v1966_v15 = vmul.f32 %v3099_v4, %v3097_v61 }
 0x8f8   : > { %v1965_v25 = vmul.f32 %v3101_v13, %v1963_v5  ;;  %v3103_v35 = vpop.eup %3102 }
 0x8fa   : > { %v3860_v33 = vadd.f32 %v1966_v15, %v1965_v25  ;;  %v2174_v15 = vld [vmem:[%s3941_s6] sm:$0x1] }
 0x8fc   : > { %3104 = vtanh.f32 %v3860_v33  ;;  %v2151_v47 = vrot.slane %v3860_v33, 7 }
 0x906   : > { %v3105_v34 = vpop.eup %3104 }
 0x907   : > { %v1969_v56 = vmul.f32 %v3105_v34, %v3103_v35 }
 0x909   : > { %v1971_v20 = vrot.slane %v1969_v56, 6 }
 0x90b   : > { %2038 = vmatmul.mubr.f32.vlgmr.msra.gmra.mrb[14].mxu0 %v1971_v20  ;;  %2109 = vmatmul.mubr.f32.vlgmr.msra.gmra.mrb[22].mxu1 %v1971_v20 }
 0x90c   : > { %2414 = vmatprep.mubr.msk.f32.mxu0 %vm3131_vm0, %v3132_v6  ;;  %2959 = vmatpush3.bf16.msra.mxu0 %v2958_v26  ;;  %v2161_v6 = vld [vmem:[%s3940_s5 + $0x18] sm:$0xff] }
 0x90d   : > { %2960 = vmatprep.subr.bf16.mxu0 %v3130_v3  ;;  %v2961_v37 = vpack.c.bf16 %v2161_v6, %v2160_v30 }
 0x910   : > { %2962 = vmatpush3.bf16.msra.mxu0 %v2961_v37 }
 0x911   : > { %2963 = vmatprep.subr.bf16.mxu0 %v3130_v3 }
 0x914   : > { %2965 = vmatpush3.bf16.msra.mxu0 %v2964_v41 }
 0x915   : > { %2966 = vmatprep.subr.bf16.mxu0 %v3130_v3 }
 0x918   : > { %2968 = vmatpush3.bf16.msra.mxu0 %v2967_v43 }
 0x919   : > { %2969 = vmatprep.subr.bf16.mxu0 %v3130_v3 }
 0x91c   : > { %2971 = vmatpush3.bf16.msra.mxu0 %v2970_v50 }
 0x91d   : > { %2972 = vmatprep.subr.bf16.mxu0 %v3130_v3 }
 0x920   : > { %2974 = vmatpush3.bf16.msra.mxu0 %v2973_v55 }
 0x921   : > { %2975 = vmatprep.subr.bf16.mxu0 %v3130_v3 }
 0x924   : > { %2977 = vmatpush3.bf16.msra.mxu0 %v2976_v2 }
 0x925   : > { %2978 = vmatprep.subr.bf16.mxu0 %v3130_v3 }
 0x928   : > { %2980 = vmatpush3.bf16.msra.mxu0 %v2979_v9 }
 0x9de   : > { %v2039_v10 = vpop.f32.mrb[14].mxu0  ;;  %v2110_v18 = vpop.f32.mrb[22].mxu1 }
 0x9df   : > { %v2119_v19 = vrot.slane %v2039_v10, 1  ;;  %v2041_v16 = vpop.f32.mrb[15].mxu0  ;;  %v2112_v17 = vpop.f32.mrb[23].mxu1  ;;  %v2121_v46 = vrot.slane %v2110_v18, 1 }
 0x9e0   : > { %v2120_v22 = vrot.slane %v2041_v16, 1  ;;  %v2122_v39 = vrot.slane %v2112_v17, 1 }
 0x9e1   : > { %v2127_v23 = vadd.f32 %v2119_v19, %v3599_v1  ;;  %v2129_v51 = vadd.f32 %v2121_v46, %v3603_v31 }
 0x9e2   : > { %v2128_v28 = vadd.f32 %v2120_v22, %v3597_v63  ;;  %v2130_v42 = vadd.f32 %v2122_v39, %v3605_v36 }
 0x9e3   : > { %v2328_v29 = vmul.f32 -1.442695, %v2127_v23 }
 0x9e4   : > { %v2329_v32 = vmul.f32 -1.442695, %v2128_v28  ;;  %v2330_v3 = vmul.f32 -1.442695, %v2130_v42 }
 0x9e5   : > { %3106 = vpow2.f32 %v2328_v29 }
 0x9e6   : > { %3108 = vpow2.f32 %v2329_v32 }
 0x9e7   : > { %3110 = vpow2.f32 %v2330_v3 }
 0x9e8   : > { %3112 = vtanh.f32 %v2129_v51 }
 0x9ef   : > { %v3107_v59 = vpop.eup %3106 }
 0x9f0   : > { %v3109_v0 = vpop.eup %3108  ;;  %v2134_v7 = vadd.f32 1.0, %v3107_v59 }
 0x9f1   : > { %v2140_v14 = vadd.f32 1.0, %v3109_v0  ;;  %v3111_v63 = vpop.eup %3110 }
 0x9f2   : > { %3114 = vrcp.f32 %v2134_v7  ;;  %v3113_v1 = vpop.eup %3112  ;;  %v2147_v54 = vadd.f32 1.0, %v3111_v63 }
 0x9f3   : > { %3116 = vrcp.f32 %v2140_v14 }
 0x9f4   : > { %3118 = vrcp.f32 %v2147_v54 }
 0x9fc   : > { %v3115_v45 = vpop.eup %3114 }
 0x9fd   : > { %v3117_v53 = vpop.eup %3116  ;;  %v2154_v36 = vmul.f32 %v3115_v45, %v3113_v1 }
 0x9fe   : > { %v2153_v60 = vmul.f32 %v3117_v53, %v2151_v47  ;;  %v3119_v31 = vpop.eup %3118 }
 0xa00   : > { %v2155_v61 = vadd.f32 %v2154_v36, %v2153_v60 }
 0xa02   : > { %3120 = vtanh.f32 %v2155_v61 }
 0xa0c   : > { %v3121_v4 = vpop.eup %3120 }
 0xa0d   : > { %v2157_v5 = vmul.f32 %v3121_v4, %v3119_v31 }
 0xa0f   : > { %v2176_v13 = vrot.slane %v2157_v5, 7 }
 0xa11   : > { %2415 = vmatmul.mubr.f32.vlgmr.msra.gmra.mrb[16].mxu0 %v2176_v13 }
 0xae4   : > { %v2244_v24 = vpop.f32.mrb[16].mxu0 }
 0xae5   : > { %v2245_v25 = vadd.f32 %v2244_v24, %v2174_v15  ;;  %v2416_v33 = vpop.f32.mrb[17].mxu0 }
 0xae7   : > { %2249 = vst.msk [vmem:[%s271_s26] sm:$0x1] %vm2248_vm2, %v2245_v25 }
 0xae8 PF: > { %s17_s24 = sadd.s32 1, %s3128_s24  }
 0xae9   : > { %p14_p4 = scmp.ge.s32.totalorder %s17_s24, 4  }
 0xaeb   :  { %16 = sbr.rel (!%p14_p4) target bundleno = 1 (0x1), region = 78 }

</bundles_post_ra>
